<compile_context>
chip_gen: v7x
topology: tpu7x:2x2x1
jax: 0.10.0
libtpu: 0.0.40
codegen_flags: <defaults>
</compile_context>

<pallas_src>
import functools
import math

import jax
import jax.numpy as jnp
from jax.experimental import pallas as pl
from jax.experimental.pallas import tpu as pltpu


# ----------------------------------------------------------------------------
# Fused Pallas kernel (one grid step per transformer block)
# ----------------------------------------------------------------------------
def _layernorm(v, g, b, eps=1e-5):
    mu = jnp.mean(v, axis=-1, keepdims=True)
    var = jnp.mean(jnp.square(v - mu), axis=-1, keepdims=True)
    return (v - mu) * jax.lax.rsqrt(var + eps) * g + b


def decoder_kernel(x_ref, ln1g_ref, ln1b_ref, wqkv_ref, bqkv_ref, wo_ref, bo_ref,
                   ln2g_ref, ln2b_ref, w1_ref, b1_ref, w2_ref, b2_ref, wout_ref,
                   o_ref, x_acc, *, num_heads, batch, seq):
    blk = pl.program_id(0)

    # Load the input residual stream into the persistent VMEM scratch once.
    @pl.when(blk == 0)
    def _():
        x_acc[...] = x_ref[...].astype(jnp.float32)

    x = x_acc[...]                                # (M, D) f32, M = B*N
    M, D = x.shape
    H = num_heads
    Dh = D // H
    B, N = batch, seq

    # --- Multi-head self-attention branch (pre-LN) ---
    h1 = _layernorm(x, ln1g_ref[0], ln1b_ref[0])
    # Single packed QKV matmul (bf16 operands, f32 accumulation). The 1/sqrt(Dh)
    # scale is already folded into the q columns of w_qkv / b_qkv at init.
    qkv = jnp.dot(h1.astype(jnp.bfloat16), wqkv_ref[0],
                  preferred_element_type=jnp.float32) + bqkv_ref[0]

    def split_heads(t):
        # (M, D) -> (G, N, Dh) with g = h * B + b; static sublane/lane slices +
        # leading-axis stack (no tiled-dim reshapes/transposes).
        parts = [t[b * N:(b + 1) * N, h * Dh:(h + 1) * Dh]
                 for h in range(H) for b in range(B)]
        return jnp.stack(parts, axis=0)

    q = split_heads(qkv[:, 0 * D:1 * D]).astype(jnp.bfloat16)
    k = split_heads(qkv[:, 1 * D:2 * D]).astype(jnp.bfloat16)
    v = split_heads(qkv[:, 2 * D:3 * D]).astype(jnp.bfloat16)

    # One batched einsum over the merged g = H*B axis for scores and AV.
    s = jnp.einsum('gqd,gkd->gqk', q, k, preferred_element_type=jnp.float32)
    s = s - jnp.max(s, axis=-1, keepdims=True)
    p = jnp.exp(s)
    p = p * pl.reciprocal(jnp.sum(p, axis=-1, keepdims=True), approx=True)
    av = jnp.einsum('gqk,gkd->gqd', p.astype(jnp.bfloat16), v,
                    preferred_element_type=jnp.float32)

    # Lane re-pack (G, N, Dh) -> (M, D), then ONE packed output projection.
    av_md = jnp.concatenate(
        [jnp.concatenate([av[h * B + b] for h in range(H)], axis=-1)
         for b in range(B)],
        axis=0)
    attn = jnp.dot(av_md.astype(jnp.bfloat16), wo_ref[0],
                   preferred_element_type=jnp.float32) + bo_ref[0]
    x = x + attn                                  # residual (dropout = identity)

    # --- MLP branch (pre-LN) ---
    h2 = _layernorm(x, ln2g_ref[0], ln2b_ref[0])
    m = jnp.dot(h2.astype(jnp.bfloat16), w1_ref[0],
                preferred_element_type=jnp.float32) + b1_ref[0]
    # TODO(synk): PyTorch nn.GELU default is erf-exact; tanh approximation used.
    m = jax.nn.gelu(m, approximate=True)
    m = jnp.dot(m.astype(jnp.bfloat16), w2_ref[0],
                preferred_element_type=jnp.float32) + b2_ref[0]
    x = x + m
    x_acc[...] = x

    # --- out_layer on the last layer step: tanh(x @ W_out_pad). W_out is
    # zero-padded to 128 output lanes so the store is lane-dense (unmasked). ---
    @pl.when(blk == pl.num_programs(0) - 1)
    def _():
        y = jnp.dot(x.astype(jnp.bfloat16), wout_ref[...],
                    preferred_element_type=jnp.float32)
        o_ref[...] = jnp.tanh(y).astype(o_ref.dtype)


# ----------------------------------------------------------------------------
# Wrapper — no per-call weight relayout; weights are prepared once at init.
# ----------------------------------------------------------------------------
def decoder_forward(x, params, num_heads, in_channels, patch_size):
    B, N, D = x.shape
    M = B * N
    depth = params["w_qkv"].shape[0]
    Dout = in_channels * patch_size ** 2
    Dout_pad = params["w_out"].shape[1]

    xf = x.reshape(M, D)                          # glue reshape only
    operands = [xf,
                params["ln1_g"], params["ln1_b"],
                params["w_qkv"], params["b_qkv"],
                params["w_o"], params["b_o"],
                params["ln2_g"], params["ln2_b"],
                params["w1"], params["b1"],
                params["w2"], params["b2"],
                params["w_out"]]

    def layer_spec(a):                            # stream one layer per step
        return pl.BlockSpec((1,) + a.shape[1:],
                            lambda d: (d,) + (0,) * (a.ndim - 1))

    def const_spec(a):                            # resident across all steps
        return pl.BlockSpec(a.shape, lambda d: (0,) * a.ndim)

    in_specs = ([const_spec(xf)]
                + [layer_spec(a) for a in operands[1:13]]
                + [const_spec(params["w_out"])])

    kernel = functools.partial(decoder_kernel, num_heads=num_heads,
                               batch=B, seq=N)
    y = pl.pallas_call(
        kernel,
        out_shape=jax.ShapeDtypeStruct((M, Dout_pad), x.dtype),
        grid=(depth,),
        in_specs=in_specs,
        out_specs=pl.BlockSpec((M, Dout_pad), lambda d: (0, 0)),
        scratch_shapes=[pltpu.VMEM((M, D), jnp.float32)],
        compiler_params=pltpu.CompilerParams(
            dimension_semantics=("arbitrary",)),
    )(*operands)
    # Drop the lane pad, then Unflatten(2, (C, P, P)) glue.
    return y[:, :Dout].reshape(B, N, in_channels, patch_size, patch_size)


# ----------------------------------------------------------------------------
# Deterministic parameter init (kaiming_uniform-style: U(-sqrt(6/fan_in), +)).
# All layout plumbing done ONCE here: stack along depth, fold q scale, bf16
# weight storage, lane-pad w_out.
# ----------------------------------------------------------------------------
def kaiming_uniform(key, shape, fan_in):
    bound = math.sqrt(6.0 / fan_in)
    return jax.random.uniform(key, shape, jnp.float32, -bound, bound)


def init_params(key, embed_dim, in_channels, patch_size, depth, num_heads):
    D = embed_dim
    Dh = D // num_heads
    scale = 1.0 / math.sqrt(Dh)
    lane = 128
    Dout = in_channels * patch_size ** 2
    Dout_pad = ((Dout + lane - 1) // lane) * lane

    ln1_g, ln1_b, w_qkv, b_qkv, w_o, b_o = [], [], [], [], [], []
    ln2_g, ln2_b, w1, b1, w2, b2 = [], [], [], [], [], []
    for _ in range(depth):
        key, kq, ko, k1, k2 = jax.random.split(key, 5)
        wq = kaiming_uniform(kq, (D, 3 * D), D)
        bq = jnp.zeros((1, 3 * D), jnp.float32)
        # Fold the 1/sqrt(Dh) attention scale into the q columns (zero runtime cost).
        wq = wq.at[:, :D].multiply(scale)
        bq = bq.at[:, :D].multiply(scale)
        ln1_g.append(jnp.ones((1, D), jnp.float32))
        ln1_b.append(jnp.zeros((1, D), jnp.float32))
        w_qkv.append(wq)
        b_qkv.append(bq)
        w_o.append(kaiming_uniform(ko, (D, D), D))
        b_o.append(jnp.zeros((1, D), jnp.float32))
        ln2_g.append(jnp.ones((1, D), jnp.float32))
        ln2_b.append(jnp.zeros((1, D), jnp.float32))
        w1.append(kaiming_uniform(k1, (D, 4 * D), D))
        b1.append(jnp.zeros((1, 4 * D), jnp.float32))
        w2.append(kaiming_uniform(k2, (4 * D, D), 4 * D))
        b2.append(jnp.zeros((1, D), jnp.float32))

    key, k_out = jax.random.split(key)
    # nn.Linear(embed_dim, in_channels*patch_size**2, bias=False), stored (D, Dout).
    # TODO(synk): PyTorch Linear stores (Dout, D); transpose when porting real weights.
    w_out = kaiming_uniform(k_out, (D, Dout), D)
    w_out_pad = jnp.zeros((D, Dout_pad), jnp.float32).at[:, :Dout].set(w_out)

    st = lambda xs: jnp.stack(xs, axis=0)
    bf = lambda a: a.astype(jnp.bfloat16)
    return dict(
        ln1_g=st(ln1_g), ln1_b=st(ln1_b),
        w_qkv=bf(st(w_qkv)), b_qkv=st(b_qkv),
        w_o=bf(st(w_o)), b_o=st(b_o),
        ln2_g=st(ln2_g), ln2_b=st(ln2_b),
        w1=bf(st(w1)), b1=st(b1),
        w2=bf(st(w2)), b2=st(b2),
        w_out=bf(w_out_pad),
    )


# ----------------------------------------------------------------------------
if __name__ == "__main__":
    embed_dim = 32
    in_channels = 4
    patch_size = 4
    depth = 2
    num_heads = 4
    dropout = 0.0        # eval mode -> identity

    B, N = 2, 8          # batch, number of patch tokens

    key = jax.random.PRNGKey(0)
    k_params, k_x = jax.random.split(key)
    params = init_params(k_params, embed_dim, in_channels, patch_size, depth,
                         num_heads)
    x = jax.random.normal(k_x, (B, N, embed_dim), jnp.float32)

    y = decoder_forward(x, params, num_heads, in_channels, patch_size)
    y = jax.block_until_ready(y)

    assert y.shape == (B, N, in_channels, patch_size, patch_size), y.shape
    assert bool(jnp.all(jnp.isfinite(y)))
    assert bool(jnp.all(jnp.abs(y) <= 1.0))   # tanh output range
    print("KERNEL_OK")
</pallas_src>

<mosaic_0001>
module attributes {stable_mosaic.version = 11 : i64} {
  func.func @decoder_kernel(%arg0: i32, %arg1: memref<16x32xf32, #tpu.memory_space<vmem>>, %arg2: memref<1x1x32xf32, #tpu.memory_space<vmem>>, %arg3: memref<1x1x32xf32, #tpu.memory_space<vmem>>, %arg4: memref<1x32x96xbf16, #tpu.memory_space<vmem>>, %arg5: memref<1x1x96xf32, #tpu.memory_space<vmem>>, %arg6: memref<1x32x32xbf16, #tpu.memory_space<vmem>>, %arg7: memref<1x1x32xf32, #tpu.memory_space<vmem>>, %arg8: memref<1x1x32xf32, #tpu.memory_space<vmem>>, %arg9: memref<1x1x32xf32, #tpu.memory_space<vmem>>, %arg10: memref<1x32x128xbf16, #tpu.memory_space<vmem>>, %arg11: memref<1x1x128xf32, #tpu.memory_space<vmem>>, %arg12: memref<1x128x32xbf16, #tpu.memory_space<vmem>>, %arg13: memref<1x1x32xf32, #tpu.memory_space<vmem>>, %arg14: memref<32x128xbf16, #tpu.memory_space<vmem>>, %arg15: memref<16x128xf32, #tpu.memory_space<vmem>>, %arg16: memref<16x32xf32, #tpu.memory_space<vmem>>) attributes {dimension_semantics = [#tpu.dimension_semantics<arbitrary>], iteration_bounds = array<i64: 2>, scalar_prefetch = 0 : i64, scratch_operands = 1 : i64, tpu.core_type = #tpu.core_type<tc>, window_params = [{pipeline_mode = #tpu.pipeline_mode<synchronous>, transform_indices = @transform_0, window_bounds = array<i64: 16, 32>}, {transform_indices = @transform_1, window_bounds = array<i64: 1, 1, 32>}, {transform_indices = @transform_2, window_bounds = array<i64: 1, 1, 32>}, {transform_indices = @transform_3, window_bounds = array<i64: 1, 32, 96>}, {transform_indices = @transform_4, window_bounds = array<i64: 1, 1, 96>}, {transform_indices = @transform_5, window_bounds = array<i64: 1, 32, 32>}, {transform_indices = @transform_6, window_bounds = array<i64: 1, 1, 32>}, {transform_indices = @transform_7, window_bounds = array<i64: 1, 1, 32>}, {transform_indices = @transform_8, window_bounds = array<i64: 1, 1, 32>}, {transform_indices = @transform_9, window_bounds = array<i64: 1, 32, 128>}, {transform_indices = @transform_10, window_bounds = array<i64: 1, 1, 128>}, {transform_indices = @transform_11, window_bounds = array<i64: 1, 128, 32>}, {transform_indices = @transform_12, window_bounds = array<i64: 1, 1, 32>}, {pipeline_mode = #tpu.pipeline_mode<synchronous>, transform_indices = @transform_13, window_bounds = array<i64: 32, 128>}, {pipeline_mode = #tpu.pipeline_mode<synchronous>, transform_indices = @transform_14, window_bounds = array<i64: 16, 128>}]} {
    %c0_i32 = arith.constant 0 : i32
    %0 = arith.cmpi eq, %arg0, %c0_i32 : i32
    %1 = arith.extui %0 : i1 to i32
    %c0_i32_0 = arith.constant 0 : i32
    %2 = arith.cmpi ne, %1, %c0_i32_0 : i32
    scf.if %2 {
      %c0_62 = arith.constant 0 : index
      %c0_63 = arith.constant 0 : index
      %196 = vector.load %arg1[%c0_62, %c0_63] : memref<16x32xf32, #tpu.memory_space<vmem>>, vector<16x32xf32>
      %c0_64 = arith.constant 0 : index
      %c0_65 = arith.constant 0 : index
      %197 = vector.load %arg16[%c0_64, %c0_65] : memref<16x32xf32, #tpu.memory_space<vmem>>, vector<16x32xf32>
      tpu.vector_store %arg16[%c0_64, %c0_65], %196 {strides = array<i32>} : memref<16x32xf32, #tpu.memory_space<vmem>>, vector<16x32xf32>,
    } else {
    }
    %c0 = arith.constant 0 : index
    %c0_1 = arith.constant 0 : index
    %3 = vector.load %arg16[%c0, %c0_1] : memref<16x32xf32, #tpu.memory_space<vmem>>, vector<16x32xf32>
    %c0_2 = arith.constant 0 : index
    %c0_3 = arith.constant 0 : index
    %c0_4 = arith.constant 0 : index
    %4 = vector.load %arg2[%c0_2, %c0_3, %c0_4] : memref<1x1x32xf32, #tpu.memory_space<vmem>>, vector<1x1x32xf32>
    %5 = vector.shape_cast %4 : vector<1x1x32xf32> to vector<1x32xf32>
    %c0_5 = arith.constant 0 : index
    %c0_6 = arith.constant 0 : index
    %c0_7 = arith.constant 0 : index
    %6 = vector.load %arg3[%c0_5, %c0_6, %c0_7] : memref<1x1x32xf32, #tpu.memory_space<vmem>>, vector<1x1x32xf32>
    %7 = vector.shape_cast %6 : vector<1x1x32xf32> to vector<1x32xf32>
    %cst = arith.constant dense<0.000000e+00> : vector<16xf32>
    %8 = vector.multi_reduction <add>, %3, %cst [1] : vector<16x32xf32> to vector<16xf32>
    %9 = vector.shape_cast %8 : vector<16xf32> to vector<16x1xf32>
    %cst_8 = arith.constant 3.200000e+01 : f32
    %10 = vector.broadcast %cst_8 : f32 to vector<16x1xf32>
    %11 = arith.divf %9, %10 : vector<16x1xf32>
    %12 = vector.broadcast %11 : vector<16x1xf32> to vector<16x32xf32>
    %13 = arith.subf %3, %12 : vector<16x32xf32>
    %14 = arith.mulf %13, %13 : vector<16x32xf32>
    %cst_9 = arith.constant dense<0.000000e+00> : vector<16xf32>
    %15 = vector.multi_reduction <add>, %14, %cst_9 [1] : vector<16x32xf32> to vector<16xf32>
    %16 = vector.shape_cast %15 : vector<16xf32> to vector<16x1xf32>
    %cst_10 = arith.constant 3.200000e+01 : f32
    %17 = vector.broadcast %cst_10 : f32 to vector<16x1xf32>
    %18 = arith.divf %16, %17 : vector<16x1xf32>
    %19 = vector.broadcast %11 : vector<16x1xf32> to vector<16x32xf32>
    %20 = arith.subf %3, %19 : vector<16x32xf32>
    %cst_11 = arith.constant 9.99999974E-6 : f32
    %21 = vector.broadcast %cst_11 : f32 to vector<16x1xf32>
    %22 = arith.addf %18, %21 : vector<16x1xf32>
    %23 = math.rsqrt %22 : vector<16x1xf32>
    %24 = vector.broadcast %23 : vector<16x1xf32> to vector<16x32xf32>
    %25 = arith.mulf %20, %24 : vector<16x32xf32>
    %26 = vector.broadcast %5 : vector<1x32xf32> to vector<16x32xf32>
    %27 = arith.mulf %25, %26 : vector<16x32xf32>
    %28 = vector.broadcast %7 : vector<1x32xf32> to vector<16x32xf32>
    %29 = arith.addf %27, %28 : vector<16x32xf32>
    %30 = arith.truncf %29 : vector<16x32xf32> to vector<16x32xbf16>
    %c0_12 = arith.constant 0 : index
    %c0_13 = arith.constant 0 : index
    %c0_14 = arith.constant 0 : index
    %31 = vector.load %arg4[%c0_12, %c0_13, %c0_14] : memref<1x32x96xbf16, #tpu.memory_space<vmem>>, vector<1x32x96xbf16>
    %32 = vector.shape_cast %31 : vector<1x32x96xbf16> to vector<32x96xbf16>
    %cst_15 = arith.constant dense<0.000000e+00> : vector<16x96xf32>
    %33 = tpu.matmul %30, %32, %cst_15 {dimension_numbers = #tpu.dot_dimension_numbers<[1], [0], [0], [1], [0, 0, 1, 1], [], []>} : vector<16x32xbf16>, vector<32x96xbf16>, vector<16x96xf32> -> vector<16x96xf32>
    %c0_16 = arith.constant 0 : index
    %c0_17 = arith.constant 0 : index
    %c0_18 = arith.constant 0 : index
    %34 = vector.load %arg5[%c0_16, %c0_17, %c0_18] : memref<1x1x96xf32, #tpu.memory_space<vmem>>, vector<1x1x96xf32>
    %35 = vector.shape_cast %34 : vector<1x1x96xf32> to vector<1x96xf32>
    %36 = vector.broadcast %35 : vector<1x96xf32> to vector<16x96xf32>
    %37 = arith.addf %33, %36 : vector<16x96xf32>
    %38 = vector.extract_strided_slice %37 {offsets = [0, 0], sizes = [16, 32], strides = [1, 1]} : vector<16x96xf32> to vector<16x32xf32>
    %39 = vector.extract_strided_slice %38 {offsets = [0, 0], sizes = [8, 8], strides = [1, 1]} : vector<16x32xf32> to vector<8x8xf32>
    %40 = vector.extract_strided_slice %38 {offsets = [8, 0], sizes = [8, 8], strides = [1, 1]} : vector<16x32xf32> to vector<8x8xf32>
    %41 = vector.extract_strided_slice %38 {offsets = [0, 8], sizes = [8, 8], strides = [1, 1]} : vector<16x32xf32> to vector<8x8xf32>
    %42 = vector.extract_strided_slice %38 {offsets = [8, 8], sizes = [8, 8], strides = [1, 1]} : vector<16x32xf32> to vector<8x8xf32>
    %43 = vector.extract_strided_slice %38 {offsets = [0, 16], sizes = [8, 8], strides = [1, 1]} : vector<16x32xf32> to vector<8x8xf32>
    %44 = vector.extract_strided_slice %38 {offsets = [8, 16], sizes = [8, 8], strides = [1, 1]} : vector<16x32xf32> to vector<8x8xf32>
    %45 = vector.extract_strided_slice %38 {offsets = [0, 24], sizes = [8, 8], strides = [1, 1]} : vector<16x32xf32> to vector<8x8xf32>
    %46 = vector.extract_strided_slice %38 {offsets = [8, 24], sizes = [8, 8], strides = [1, 1]} : vector<16x32xf32> to vector<8x8xf32>
    %47 = vector.shape_cast %39 : vector<8x8xf32> to vector<1x8x8xf32>
    %48 = vector.shape_cast %40 : vector<8x8xf32> to vector<1x8x8xf32>
    %49 = vector.shape_cast %41 : vector<8x8xf32> to vector<1x8x8xf32>
    %50 = vector.shape_cast %42 : vector<8x8xf32> to vector<1x8x8xf32>
    %51 = vector.shape_cast %43 : vector<8x8xf32> to vector<1x8x8xf32>
    %52 = vector.shape_cast %44 : vector<8x8xf32> to vector<1x8x8xf32>
    %53 = vector.shape_cast %45 : vector<8x8xf32> to vector<1x8x8xf32>
    %54 = vector.shape_cast %46 : vector<8x8xf32> to vector<1x8x8xf32>
    %55 = tpu.concatenate %47, %48, %49, %50, %51, %52, %53, %54 in 0 : vector<1x8x8xf32>, vector<1x8x8xf32>, vector<1x8x8xf32>, vector<1x8x8xf32>, vector<1x8x8xf32>, vector<1x8x8xf32>, vector<1x8x8xf32>, vector<1x8x8xf32> -> vector<8x8x8xf32>
    %56 = arith.truncf %55 : vector<8x8x8xf32> to vector<8x8x8xbf16>
    %57 = vector.extract_strided_slice %37 {offsets = [0, 32], sizes = [16, 32], strides = [1, 1]} : vector<16x96xf32> to vector<16x32xf32>
    %58 = vector.extract_strided_slice %57 {offsets = [0, 0], sizes = [8, 8], strides = [1, 1]} : vector<16x32xf32> to vector<8x8xf32>
    %59 = vector.extract_strided_slice %57 {offsets = [8, 0], sizes = [8, 8], strides = [1, 1]} : vector<16x32xf32> to vector<8x8xf32>
    %60 = vector.extract_strided_slice %57 {offsets = [0, 8], sizes = [8, 8], strides = [1, 1]} : vector<16x32xf32> to vector<8x8xf32>
    %61 = vector.extract_strided_slice %57 {offsets = [8, 8], sizes = [8, 8], strides = [1, 1]} : vector<16x32xf32> to vector<8x8xf32>
    %62 = vector.extract_strided_slice %57 {offsets = [0, 16], sizes = [8, 8], strides = [1, 1]} : vector<16x32xf32> to vector<8x8xf32>
    %63 = vector.extract_strided_slice %57 {offsets = [8, 16], sizes = [8, 8], strides = [1, 1]} : vector<16x32xf32> to vector<8x8xf32>
    %64 = vector.extract_strided_slice %57 {offsets = [0, 24], sizes = [8, 8], strides = [1, 1]} : vector<16x32xf32> to vector<8x8xf32>
    %65 = vector.extract_strided_slice %57 {offsets = [8, 24], sizes = [8, 8], strides = [1, 1]} : vector<16x32xf32> to vector<8x8xf32>
    %66 = vector.shape_cast %58 : vector<8x8xf32> to vector<1x8x8xf32>
    %67 = vector.shape_cast %59 : vector<8x8xf32> to vector<1x8x8xf32>
    %68 = vector.shape_cast %60 : vector<8x8xf32> to vector<1x8x8xf32>
    %69 = vector.shape_cast %61 : vector<8x8xf32> to vector<1x8x8xf32>
    %70 = vector.shape_cast %62 : vector<8x8xf32> to vector<1x8x8xf32>
    %71 = vector.shape_cast %63 : vector<8x8xf32> to vector<1x8x8xf32>
    %72 = vector.shape_cast %64 : vector<8x8xf32> to vector<1x8x8xf32>
    %73 = vector.shape_cast %65 : vector<8x8xf32> to vector<1x8x8xf32>
    %74 = tpu.concatenate %66, %67, %68, %69, %70, %71, %72, %73 in 0 : vector<1x8x8xf32>, vector<1x8x8xf32>, vector<1x8x8xf32>, vector<1x8x8xf32>, vector<1x8x8xf32>, vector<1x8x8xf32>, vector<1x8x8xf32>, vector<1x8x8xf32> -> vector<8x8x8xf32>
    %75 = arith.truncf %74 : vector<8x8x8xf32> to vector<8x8x8xbf16>
    %76 = vector.extract_strided_slice %37 {offsets = [0, 64], sizes = [16, 32], strides = [1, 1]} : vector<16x96xf32> to vector<16x32xf32>
    %77 = vector.extract_strided_slice %76 {offsets = [0, 0], sizes = [8, 8], strides = [1, 1]} : vector<16x32xf32> to vector<8x8xf32>
    %78 = vector.extract_strided_slice %76 {offsets = [8, 0], sizes = [8, 8], strides = [1, 1]} : vector<16x32xf32> to vector<8x8xf32>
    %79 = vector.extract_strided_slice %76 {offsets = [0, 8], sizes = [8, 8], strides = [1, 1]} : vector<16x32xf32> to vector<8x8xf32>
    %80 = vector.extract_strided_slice %76 {offsets = [8, 8], sizes = [8, 8], strides = [1, 1]} : vector<16x32xf32> to vector<8x8xf32>
    %81 = vector.extract_strided_slice %76 {offsets = [0, 16], sizes = [8, 8], strides = [1, 1]} : vector<16x32xf32> to vector<8x8xf32>
    %82 = vector.extract_strided_slice %76 {offsets = [8, 16], sizes = [8, 8], strides = [1, 1]} : vector<16x32xf32> to vector<8x8xf32>
    %83 = vector.extract_strided_slice %76 {offsets = [0, 24], sizes = [8, 8], strides = [1, 1]} : vector<16x32xf32> to vector<8x8xf32>
    %84 = vector.extract_strided_slice %76 {offsets = [8, 24], sizes = [8, 8], strides = [1, 1]} : vector<16x32xf32> to vector<8x8xf32>
    %85 = vector.shape_cast %77 : vector<8x8xf32> to vector<1x8x8xf32>
    %86 = vector.shape_cast %78 : vector<8x8xf32> to vector<1x8x8xf32>
    %87 = vector.shape_cast %79 : vector<8x8xf32> to vector<1x8x8xf32>
    %88 = vector.shape_cast %80 : vector<8x8xf32> to vector<1x8x8xf32>
    %89 = vector.shape_cast %81 : vector<8x8xf32> to vector<1x8x8xf32>
    %90 = vector.shape_cast %82 : vector<8x8xf32> to vector<1x8x8xf32>
    %91 = vector.shape_cast %83 : vector<8x8xf32> to vector<1x8x8xf32>
    %92 = vector.shape_cast %84 : vector<8x8xf32> to vector<1x8x8xf32>
    %93 = tpu.concatenate %85, %86, %87, %88, %89, %90, %91, %92 in 0 : vector<1x8x8xf32>, vector<1x8x8xf32>, vector<1x8x8xf32>, vector<1x8x8xf32>, vector<1x8x8xf32>, vector<1x8x8xf32>, vector<1x8x8xf32>, vector<1x8x8xf32> -> vector<8x8x8xf32>
    %94 = arith.truncf %93 : vector<8x8x8xf32> to vector<8x8x8xbf16>
    "tpu.trace_start"() <{level = 10 : i32, message = "gqd,gkd->gqk"}> : () -> ()
    %cst_19 = arith.constant dense<0.000000e+00> : vector<8x8x8xf32>
    %95 = tpu.matmul %56, %75, %cst_19 {dimension_numbers = #tpu.dot_dimension_numbers<[2], [2], [1], [1], [0, 0, 0, 1, 1, 1], [0], [0]>} : vector<8x8x8xbf16>, vector<8x8x8xbf16>, vector<8x8x8xf32> -> vector<8x8x8xf32>
    "tpu.trace_stop"() : () -> ()
    %cst_20 = arith.constant dense<0xFF800000> : vector<8x8xf32>
    %96 = vector.multi_reduction <maximumf>, %95, %cst_20 [2] : vector<8x8x8xf32> to vector<8x8xf32>
    %97 = vector.shape_cast %96 : vector<8x8xf32> to vector<8x8x1xf32>
    %98 = vector.broadcast %97 : vector<8x8x1xf32> to vector<8x8x8xf32>
    %99 = arith.subf %95, %98 : vector<8x8x8xf32>
    %100 = math.exp %99 : vector<8x8x8xf32>
    %cst_21 = arith.constant dense<0.000000e+00> : vector<8x8xf32>
    %101 = vector.multi_reduction <add>, %100, %cst_21 [2] : vector<8x8x8xf32> to vector<8x8xf32>
    %102 = vector.shape_cast %101 : vector<8x8xf32> to vector<8x8x1xf32>
    %103 = tpu.reciprocal %102 {approx = true} : vector<8x8x1xf32> -> vector<8x8x1xf32>
    %104 = vector.broadcast %103 : vector<8x8x1xf32> to vector<8x8x8xf32>
    %105 = arith.mulf %100, %104 : vector<8x8x8xf32>
    %106 = arith.truncf %105 : vector<8x8x8xf32> to vector<8x8x8xbf16>
    "tpu.trace_start"() <{level = 10 : i32, message = "gqk,gkd->gqd"}> : () -> ()
    %cst_22 = arith.constant dense<0.000000e+00> : vector<8x8x8xf32>
    %107 = tpu.matmul %106, %94, %cst_22 {dimension_numbers = #tpu.dot_dimension_numbers<[2], [1], [1], [2], [0, 0, 0, 1, 1, 2], [0], [0]>} : vector<8x8x8xbf16>, vector<8x8x8xbf16>, vector<8x8x8xf32> -> vector<8x8x8xf32>
    "tpu.trace_stop"() : () -> ()
    %108 = vector.extract_strided_slice %107 {offsets = [0, 0, 0], sizes = [1, 8, 8], strides = [1, 1, 1]} : vector<8x8x8xf32> to vector<1x8x8xf32>
    %109 = vector.shape_cast %108 : vector<1x8x8xf32> to vector<8x8xf32>
    %110 = vector.extract_strided_slice %107 {offsets = [2, 0, 0], sizes = [1, 8, 8], strides = [1, 1, 1]} : vector<8x8x8xf32> to vector<1x8x8xf32>
    %111 = vector.shape_cast %110 : vector<1x8x8xf32> to vector<8x8xf32>
    %112 = vector.extract_strided_slice %107 {offsets = [4, 0, 0], sizes = [1, 8, 8], strides = [1, 1, 1]} : vector<8x8x8xf32> to vector<1x8x8xf32>
    %113 = vector.shape_cast %112 : vector<1x8x8xf32> to vector<8x8xf32>
    %114 = vector.extract_strided_slice %107 {offsets = [6, 0, 0], sizes = [1, 8, 8], strides = [1, 1, 1]} : vector<8x8x8xf32> to vector<1x8x8xf32>
    %115 = vector.shape_cast %114 : vector<1x8x8xf32> to vector<8x8xf32>
    %116 = tpu.concatenate %109, %111, %113, %115 in 1 : vector<8x8xf32>, vector<8x8xf32>, vector<8x8xf32>, vector<8x8xf32> -> vector<8x32xf32>
    %117 = vector.extract_strided_slice %107 {offsets = [1, 0, 0], sizes = [1, 8, 8], strides = [1, 1, 1]} : vector<8x8x8xf32> to vector<1x8x8xf32>
    %118 = vector.shape_cast %117 : vector<1x8x8xf32> to vector<8x8xf32>
    %119 = vector.extract_strided_slice %107 {offsets = [3, 0, 0], sizes = [1, 8, 8], strides = [1, 1, 1]} : vector<8x8x8xf32> to vector<1x8x8xf32>
    %120 = vector.shape_cast %119 : vector<1x8x8xf32> to vector<8x8xf32>
    %121 = vector.extract_strided_slice %107 {offsets = [5, 0, 0], sizes = [1, 8, 8], strides = [1, 1, 1]} : vector<8x8x8xf32> to vector<1x8x8xf32>
    %122 = vector.shape_cast %121 : vector<1x8x8xf32> to vector<8x8xf32>
    %123 = vector.extract_strided_slice %107 {offsets = [7, 0, 0], sizes = [1, 8, 8], strides = [1, 1, 1]} : vector<8x8x8xf32> to vector<1x8x8xf32>
    %124 = vector.shape_cast %123 : vector<1x8x8xf32> to vector<8x8xf32>
    %125 = tpu.concatenate %118, %120, %122, %124 in 1 : vector<8x8xf32>, vector<8x8xf32>, vector<8x8xf32>, vector<8x8xf32> -> vector<8x32xf32>
    %126 = tpu.concatenate %116, %125 in 0 : vector<8x32xf32>, vector<8x32xf32> -> vector<16x32xf32>
    %127 = arith.truncf %126 : vector<16x32xf32> to vector<16x32xbf16>
    %c0_23 = arith.constant 0 : index
    %c0_24 = arith.constant 0 : index
    %c0_25 = arith.constant 0 : index
    %128 = vector.load %arg6[%c0_23, %c0_24, %c0_25] : memref<1x32x32xbf16, #tpu.memory_space<vmem>>, vector<1x32x32xbf16>
    %129 = vector.shape_cast %128 : vector<1x32x32xbf16> to vector<32x32xbf16>
    %cst_26 = arith.constant dense<0.000000e+00> : vector<16x32xf32>
    %130 = tpu.matmul %127, %129, %cst_26 {dimension_numbers = #tpu.dot_dimension_numbers<[1], [0], [0], [1], [0, 0, 1, 1], [], []>} : vector<16x32xbf16>, vector<32x32xbf16>, vector<16x32xf32> -> vector<16x32xf32>
    %c0_27 = arith.constant 0 : index
    %c0_28 = arith.constant 0 : index
    %c0_29 = arith.constant 0 : index
    %131 = vector.load %arg7[%c0_27, %c0_28, %c0_29] : memref<1x1x32xf32, #tpu.memory_space<vmem>>, vector<1x1x32xf32>
    %132 = vector.shape_cast %131 : vector<1x1x32xf32> to vector<1x32xf32>
    %133 = vector.broadcast %132 : vector<1x32xf32> to vector<16x32xf32>
    %134 = arith.addf %130, %133 : vector<16x32xf32>
    %135 = arith.addf %3, %134 : vector<16x32xf32>
    %c0_30 = arith.constant 0 : index
    %c0_31 = arith.constant 0 : index
    %c0_32 = arith.constant 0 : index
    %136 = vector.load %arg8[%c0_30, %c0_31, %c0_32] : memref<1x1x32xf32, #tpu.memory_space<vmem>>, vector<1x1x32xf32>
    %137 = vector.shape_cast %136 : vector<1x1x32xf32> to vector<1x32xf32>
    %c0_33 = arith.constant 0 : index
    %c0_34 = arith.constant 0 : index
    %c0_35 = arith.constant 0 : index
    %138 = vector.load %arg9[%c0_33, %c0_34, %c0_35] : memref<1x1x32xf32, #tpu.memory_space<vmem>>, vector<1x1x32xf32>
    %139 = vector.shape_cast %138 : vector<1x1x32xf32> to vector<1x32xf32>
    %cst_36 = arith.constant dense<0.000000e+00> : vector<16xf32>
    %140 = vector.multi_reduction <add>, %135, %cst_36 [1] : vector<16x32xf32> to vector<16xf32>
    %141 = vector.shape_cast %140 : vector<16xf32> to vector<16x1xf32>
    %cst_37 = arith.constant 3.200000e+01 : f32
    %142 = vector.broadcast %cst_37 : f32 to vector<16x1xf32>
    %143 = arith.divf %141, %142 : vector<16x1xf32>
    %144 = vector.broadcast %143 : vector<16x1xf32> to vector<16x32xf32>
    %145 = arith.subf %135, %144 : vector<16x32xf32>
    %146 = arith.mulf %145, %145 : vector<16x32xf32>
    %cst_38 = arith.constant dense<0.000000e+00> : vector<16xf32>
    %147 = vector.multi_reduction <add>, %146, %cst_38 [1] : vector<16x32xf32> to vector<16xf32>
    %148 = vector.shape_cast %147 : vector<16xf32> to vector<16x1xf32>
    %cst_39 = arith.constant 3.200000e+01 : f32
    %149 = vector.broadcast %cst_39 : f32 to vector<16x1xf32>
    %150 = arith.divf %148, %149 : vector<16x1xf32>
    %151 = vector.broadcast %143 : vector<16x1xf32> to vector<16x32xf32>
    %152 = arith.subf %135, %151 : vector<16x32xf32>
    %cst_40 = arith.constant 9.99999974E-6 : f32
    %153 = vector.broadcast %cst_40 : f32 to vector<16x1xf32>
    %154 = arith.addf %150, %153 : vector<16x1xf32>
    %155 = math.rsqrt %154 : vector<16x1xf32>
    %156 = vector.broadcast %155 : vector<16x1xf32> to vector<16x32xf32>
    %157 = arith.mulf %152, %156 : vector<16x32xf32>
    %158 = vector.broadcast %137 : vector<1x32xf32> to vector<16x32xf32>
    %159 = arith.mulf %157, %158 : vector<16x32xf32>
    %160 = vector.broadcast %139 : vector<1x32xf32> to vector<16x32xf32>
    %161 = arith.addf %159, %160 : vector<16x32xf32>
    %162 = arith.truncf %161 : vector<16x32xf32> to vector<16x32xbf16>
    %c0_41 = arith.constant 0 : index
    %c0_42 = arith.constant 0 : index
    %c0_43 = arith.constant 0 : index
    %163 = vector.load %arg10[%c0_41, %c0_42, %c0_43] : memref<1x32x128xbf16, #tpu.memory_space<vmem>>, vector<1x32x128xbf16>
    %164 = vector.shape_cast %163 : vector<1x32x128xbf16> to vector<32x128xbf16>
    %cst_44 = arith.constant dense<0.000000e+00> : vector<16x128xf32>
    %165 = tpu.matmul %162, %164, %cst_44 {dimension_numbers = #tpu.dot_dimension_numbers<[1], [0], [0], [1], [0, 0, 1, 1], [], []>} : vector<16x32xbf16>, vector<32x128xbf16>, vector<16x128xf32> -> vector<16x128xf32>
    %c0_45 = arith.constant 0 : index
    %c0_46 = arith.constant 0 : index
    %c0_47 = arith.constant 0 : index
    %166 = vector.load %arg11[%c0_45, %c0_46, %c0_47] : memref<1x1x128xf32, #tpu.memory_space<vmem>>, vector<1x1x128xf32>
    %167 = vector.shape_cast %166 : vector<1x1x128xf32> to vector<1x128xf32>
    %168 = vector.broadcast %167 : vector<1x128xf32> to vector<16x128xf32>
    %169 = arith.addf %165, %168 : vector<16x128xf32>
    %170 = arith.mulf %169, %169 : vector<16x128xf32>
    %171 = arith.mulf %169, %170 : vector<16x128xf32>
    %cst_48 = arith.constant 4.471500e-02 : f32
    %172 = vector.broadcast %cst_48 : f32 to vector<16x128xf32>
    %173 = arith.mulf %172, %171 : vector<16x128xf32>
    %174 = arith.addf %169, %173 : vector<16x128xf32>
    %cst_49 = arith.constant 0.797884583 : f32
    %175 = vector.broadcast %cst_49 : f32 to vector<16x128xf32>
    %176 = arith.mulf %175, %174 : vector<16x128xf32>
    %177 = math.tanh %176 : vector<16x128xf32>
    %cst_50 = arith.constant 1.000000e+00 : f32
    %178 = vector.broadcast %cst_50 : f32 to vector<16x128xf32>
    %179 = arith.addf %178, %177 : vector<16x128xf32>
    %cst_51 = arith.constant 5.000000e-01 : f32
    %180 = vector.broadcast %cst_51 : f32 to vector<16x128xf32>
    %181 = arith.mulf %180, %179 : vector<16x128xf32>
    %182 = arith.mulf %169, %181 : vector<16x128xf32>
    %183 = arith.truncf %182 : vector<16x128xf32> to vector<16x128xbf16>
    %c0_52 = arith.constant 0 : index
    %c0_53 = arith.constant 0 : index
    %c0_54 = arith.constant 0 : index
    %184 = vector.load %arg12[%c0_52, %c0_53, %c0_54] : memref<1x128x32xbf16, #tpu.memory_space<vmem>>, vector<1x128x32xbf16>
    %185 = vector.shape_cast %184 : vector<1x128x32xbf16> to vector<128x32xbf16>
    %cst_55 = arith.constant dense<0.000000e+00> : vector<16x32xf32>
    %186 = tpu.matmul %183, %185, %cst_55 {dimension_numbers = #tpu.dot_dimension_numbers<[1], [0], [0], [1], [0, 0, 1, 1], [], []>} : vector<16x128xbf16>, vector<128x32xbf16>, vector<16x32xf32> -> vector<16x32xf32>
    %c0_56 = arith.constant 0 : index
    %c0_57 = arith.constant 0 : index
    %c0_58 = arith.constant 0 : index
    %187 = vector.load %arg13[%c0_56, %c0_57, %c0_58] : memref<1x1x32xf32, #tpu.memory_space<vmem>>, vector<1x1x32xf32>
    %188 = vector.shape_cast %187 : vector<1x1x32xf32> to vector<1x32xf32>
    %189 = vector.broadcast %188 : vector<1x32xf32> to vector<16x32xf32>
    %190 = arith.addf %186, %189 : vector<16x32xf32>
    %191 = arith.addf %135, %190 : vector<16x32xf32>
    %c0_59 = arith.constant 0 : index
    %c0_60 = arith.constant 0 : index
    %192 = vector.load %arg16[%c0_59, %c0_60] : memref<16x32xf32, #tpu.memory_space<vmem>>, vector<16x32xf32>
    tpu.vector_store %arg16[%c0_59, %c0_60], %191 {strides = array<i32>} : memref<16x32xf32, #tpu.memory_space<vmem>>, vector<16x32xf32>,
    %c1_i32 = arith.constant 1 : i32
    %193 = arith.cmpi eq, %arg0, %c1_i32 : i32
    %194 = arith.extui %193 : i1 to i32
    %c0_i32_61 = arith.constant 0 : i32
    %195 = arith.cmpi ne, %194, %c0_i32_61 : i32
    scf.if %195 {
      %196 = arith.truncf %191 : vector<16x32xf32> to vector<16x32xbf16>
      %c0_62 = arith.constant 0 : index
      %c0_63 = arith.constant 0 : index
      %197 = vector.load %arg14[%c0_62, %c0_63] : memref<32x128xbf16, #tpu.memory_space<vmem>>, vector<32x128xbf16>
      %cst_64 = arith.constant dense<0.000000e+00> : vector<16x128xf32>
      %198 = tpu.matmul %196, %197, %cst_64 {dimension_numbers = #tpu.dot_dimension_numbers<[1], [0], [0], [1], [0, 0, 1, 1], [], []>} : vector<16x32xbf16>, vector<32x128xbf16>, vector<16x128xf32> -> vector<16x128xf32>
      %199 = math.tanh %198 : vector<16x128xf32>
      %c0_65 = arith.constant 0 : index
      %c0_66 = arith.constant 0 : index
      %200 = vector.load %arg15[%c0_65, %c0_66] : memref<16x128xf32, #tpu.memory_space<vmem>>, vector<16x128xf32>
      tpu.vector_store %arg15[%c0_65, %c0_66], %199 {strides = array<i32>} : memref<16x128xf32, #tpu.memory_space<vmem>>, vector<16x128xf32>,
    } else {
    }
    return
  }
  func.func @transform_0(%arg0: i32) -> (i32, i32) {
    %c0_i32 = arith.constant 0 : i32
    %c0_i32_0 = arith.constant 0 : i32
    %c0_i32_1 = arith.constant 0 : i32
    return %c0_i32, %c0_i32_0 : i32, i32
  }
  func.func @transform_1(%arg0: i32) -> (i32, i32, i32) {
    %c0_i32 = arith.constant 0 : i32
    %c0_i32_0 = arith.constant 0 : i32
    %c0_i32_1 = arith.constant 0 : i32
    return %arg0, %c0_i32, %c0_i32_0 : i32, i32, i32
  }
  func.func @transform_2(%arg0: i32) -> (i32, i32, i32) {
    %c0_i32 = arith.constant 0 : i32
    %c0_i32_0 = arith.constant 0 : i32
    %c0_i32_1 = arith.constant 0 : i32
    return %arg0, %c0_i32, %c0_i32_0 : i32, i32, i32
  }
  func.func @transform_3(%arg0: i32) -> (i32, i32, i32) {
    %c0_i32 = arith.constant 0 : i32
    %c0_i32_0 = arith.constant 0 : i32
    %c0_i32_1 = arith.constant 0 : i32
    return %arg0, %c0_i32, %c0_i32_0 : i32, i32, i32
  }
  func.func @transform_4(%arg0: i32) -> (i32, i32, i32) {
    %c0_i32 = arith.constant 0 : i32
    %c0_i32_0 = arith.constant 0 : i32
    %c0_i32_1 = arith.constant 0 : i32
    return %arg0, %c0_i32, %c0_i32_0 : i32, i32, i32
  }
  func.func @transform_5(%arg0: i32) -> (i32, i32, i32) {
    %c0_i32 = arith.constant 0 : i32
    %c0_i32_0 = arith.constant 0 : i32
    %c0_i32_1 = arith.constant 0 : i32
    return %arg0, %c0_i32, %c0_i32_0 : i32, i32, i32
  }
  func.func @transform_6(%arg0: i32) -> (i32, i32, i32) {
    %c0_i32 = arith.constant 0 : i32
    %c0_i32_0 = arith.constant 0 : i32
    %c0_i32_1 = arith.constant 0 : i32
    return %arg0, %c0_i32, %c0_i32_0 : i32, i32, i32
  }
  func.func @transform_7(%arg0: i32) -> (i32, i32, i32) {
    %c0_i32 = arith.constant 0 : i32
    %c0_i32_0 = arith.constant 0 : i32
    %c0_i32_1 = arith.constant 0 : i32
    return %arg0, %c0_i32, %c0_i32_0 : i32, i32, i32
  }
  func.func @transform_8(%arg0: i32) -> (i32, i32, i32) {
    %c0_i32 = arith.constant 0 : i32
    %c0_i32_0 = arith.constant 0 : i32
    %c0_i32_1 = arith.constant 0 : i32
    return %arg0, %c0_i32, %c0_i32_0 : i32, i32, i32
  }
  func.func @transform_9(%arg0: i32) -> (i32, i32, i32) {
    %c0_i32 = arith.constant 0 : i32
    %c0_i32_0 = arith.constant 0 : i32
    %c0_i32_1 = arith.constant 0 : i32
    return %arg0, %c0_i32, %c0_i32_0 : i32, i32, i32
  }
  func.func @transform_10(%arg0: i32) -> (i32, i32, i32) {
    %c0_i32 = arith.constant 0 : i32
    %c0_i32_0 = arith.constant 0 : i32
    %c0_i32_1 = arith.constant 0 : i32
    return %arg0, %c0_i32, %c0_i32_0 : i32, i32, i32
  }
  func.func @transform_11(%arg0: i32) -> (i32, i32, i32) {
    %c0_i32 = arith.constant 0 : i32
    %c0_i32_0 = arith.constant 0 : i32
    %c0_i32_1 = arith.constant 0 : i32
    return %arg0, %c0_i32, %c0_i32_0 : i32, i32, i32
  }
  func.func @transform_12(%arg0: i32) -> (i32, i32, i32) {
    %c0_i32 = arith.constant 0 : i32
    %c0_i32_0 = arith.constant 0 : i32
    %c0_i32_1 = arith.constant 0 : i32
    return %arg0, %c0_i32, %c0_i32_0 : i32, i32, i32
  }
  func.func @transform_13(%arg0: i32) -> (i32, i32) {
    %c0_i32 = arith.constant 0 : i32
    %c0_i32_0 = arith.constant 0 : i32
    %c0_i32_1 = arith.constant 0 : i32
    return %c0_i32, %c0_i32_0 : i32, i32
  }
  func.func @transform_14(%arg0: i32) -> (i32, i32) {
    %c0_i32 = arith.constant 0 : i32
    %c0_i32_0 = arith.constant 0 : i32
    %c0_i32_1 = arith.constant 0 : i32
    return %c0_i32, %c0_i32_0 : i32, i32
  }
}

</mosaic_0001>

<bundles_post_ra>
// kernel: tpu_custom_call.1
= control target key start
LH: loop header
LB: loop body
LE: loop exit
PB: predicated region body
PF: predicated region fallthrough
CT: control target
= control target key end

     0   :  { %s3141_s0 = inlined_call_operand.vmem [shape: f32[16,32], index: 0, kind: input, shape index: {}]   ;;  %s3142_s1 = inlined_call_operand.vmem [shape: f32[2,1,32], index: 1, kind: input, shape index: {}]   ;;  %s3143_s2 = inlined_call_operand.vmem [shape: f32[2,1,32], index: 2, kind: input, shape index: {}]   ;;  %s3144_s3 = inlined_call_operand.vmem [shape: bf16[2,32,96], index: 3, kind: input, shape index: {}]   ;;  %s3145_s4 = inlined_call_operand.vmem [shape: f32[2,1,96], index: 4, kind: input, shape index: {}]   ;;  %s3146_s5 = inlined_call_operand.vmem [shape: bf16[2,32,32], index: 5, kind: input, shape index: {}]   ;;  %s3147_s6 = inlined_call_operand.vmem [shape: f32[2,1,32], index: 6, kind: input, shape index: {}]   ;;  %s3148_s7 = inlined_call_operand.vmem [shape: f32[2,1,32], index: 7, kind: input, shape index: {}]   ;;  %s3149_s8 = inlined_call_operand.vmem [shape: f32[2,1,32], index: 8, kind: input, shape index: {}]   ;;  %s3150_s9 = inlined_call_operand.vmem [shape: bf16[2,32,128], index: 9, kind: input, shape index: {}]   ;;  %s3151_s10 = inlined_call_operand.vmem [shape: f32[2,1,128], index: 10, kind: input, shape index: {}]   ;;  %s3152_s11 = inlined_call_operand.vmem [shape: bf16[2,128,32], index: 11, kind: input, shape index: {}]   ;;  %s3153_s12 = inlined_call_operand.vmem [shape: f32[2,1,32], index: 12, kind: input, shape index: {}]   ;;  %s3154_s13 = inlined_call_operand.vmem [shape: bf16[32,128], index: 13, kind: input, shape index: {}]   ;;  %s3155_s14 = inlined_call_operand.hbm [shape: f32[16,128], index: 14, kind: output, shape index: {}]  }
   0x1   :  { %3160 = sst [smem:[#allocation8_spill]] %s3144_s3 }
   0x2   :  { %3161 = sst [smem:[#allocation9_spill]] %s3146_s5 }
   0x3   :  { %3162 = sst [smem:[#allocation10_spill]] %s3154_s13 }
   0x4   :  { %3163 = sst [smem:[#allocation11_spill]] %s3155_s14 }
   0x5   :  { %19 = vsyncpa [#allocation4], 0  ;;  %s2744_s29 = smov 0  }
   0x6 LB: > { %3164 = sst [smem:[#allocation6_spill]] %s2653_s29  ;;  %s2750_s30 = sadd.s32 4294967295, %s2653_s29   ;;  %s2653_s29 = sphi %s2744_s29, %s25_s29  }
   0x7   : > { %p2231_p0 = scmp.ge.s32.totalorder %s2653_s29, 1  ;;  %p502_p1 = scmp.lt.s32.totalorder %s2653_s29, 3 }
   0x9   : > { %p503_p2 = pnand %p2231_p0, %p502_p1 }
   0xb   : > { %506 = sbr.rel (%p503_p2) target bundleno = 2994 (0xbb2), region = 76 }
  0x12   : > { %p582_p3 = scmp.lt.s32.totalorder %s2750_s30, 1  ;;  %s3165_s3 = sld [smem:[#allocation8_spill]] }
  0x13   : > { %s3166_s5 = sld [smem:[#allocation9_spill]]  ;;  %p2240_p4 = scmp.ne.s32.totalorder %s2750_s30, 0 }
  0x14   : > { %s2756_s15 = scalar_select %p582_p3, %s2750_s30, 1 }
  0x15   : > { %630 = sbr.rel (%p2240_p4) target bundleno = 28 (0x1c), region = 80  ;;  %v631_v0 = vld [vmem:[%s3141_s0] sm:$0xff] (!%p2240_p4)  ;;  %vm633_vm0 = vcmask (!%p2240_p4), 261120   ;;  %v632_v1 = vld [vmem:[%s3141_s0 + $0x8] sm:$0xff] (!%p2240_p4) }
  0x16   : > { %s2290_s22 = sshll.u32 %s2756_s15, 4  ;;  %s606_s13 = scalar_lea.vmem %s3148_s7, %s2756_s15  ;;  %634 = vst.msk [vmem:[#allocation2] sm:$0xff] (!%p2240_p4), %vm633_vm0, %v631_v0  ;;  %635 = vst.msk [vmem:[#allocation2 + $0x8] sm:$0xff] (!%p2240_p4), %vm633_vm0, %v632_v1 }
  0x17   : > { %s609_s25 = scalar_lea.vmem %s3149_s8, %s2756_s15  ;;  %s625_s23 = scalar_lea.vmem %s3153_s12, %s2756_s15 }
  0x18   : > { %s2774_s28 = scalar_lea.vmem %s3165_s3, %s2290_s22  ;;  %s2796_s3 = scalar_lea.vmem %s3150_s9, %s2290_s22 }
  0x19   : > { %s2779_s29 = scalar_lea.vmem %s3166_s5, %s2290_s22  ;;  %s617_s5 = scalar_lea.vmem %s3151_s10, %s2756_s15 }
  0x1a   : > { %3167 = sst [smem:[#allocation7_spill]] %s2779_s29  ;;  %s2293_s29 = sshll.u32 %s2756_s15, 6 }
  0x1b   : > { %s2806_s19 = scalar_lea.vmem %s3152_s11, %s2293_s29 }
  0x1c PF: > { %vm640_vm1 = vcmask 261120   ;;  %v2553_v16 = vld [vmem:[%s2774_s28] sm:$0xff]   ;;  %v2655_v17 = vmov 0.0   ;;  %v2554_v18 = vld [vmem:[%s2774_s28 + $0x8] sm:$0xff]   ;;  %vm2656_vm2 = vmmov 0   ;;  %s3168_s16 = scalar_lea.vmem %s3142_s1, %s2756_s15  ;;  %s3169_s18 = scalar_lea.vmem %s3143_s2, %s2756_s15  ;;  %vm783_vm3 = vcmask 64512  }
  0x1d   : > { %v2819_v2 = vld [vmem:[#allocation2] sm:$0xff]  ;;  %v2821_v3 = vld [vmem:[#allocation2 + $0x8] sm:$0xff]  ;;  %2347 = vmatprep.subr.bf16.mxu0 %v2655_v17  ;;  %2367 = vmatprep.subr.bf16.mxu1 %v2655_v17  ;;  %s3170_s24 = scalar_lea.vmem %s3145_s4, %s2756_s15  ;;  %s2657_s22 = smov 112   ;;  %vm1274_vm4 = vcmask 1043456   ;;  %vm1667_vm5 = vcmask 130048   ;;  %vm1669_vm6 = vcmask 195584  }
  0x1e   : > { %v641_v4 = vsel %vm640_vm1, %v2819_v2, 0.0  ;;  %v644_v5 = vsel %vm640_vm1, %v2821_v3, 0.0  ;;  %2348 = vmatpush3.bf16.msra.mxu0 %v2553_v16  ;;  %2351 = vmatprep.mubr.msk.bf16.mxu0 %vm2656_vm2, %v2655_v17  ;;  %v2241_v27 = vld [vmem:[%s3168_s16] ss:$0 sm:$0xff]  ;;  %s2658_s26 = smov 120   ;;  %s2659_s27 = smov 104  }
  0x1f   : > { %642 = vadd.xlane.f32.xlu0 %v641_v4  ;;  %2349 = vmatprep.subr.bf16.mxu0 %v2655_v17  ;;  %v2242_v31 = vld [vmem:[%s3169_s18] ss:$0 sm:$0xff]  ;;  %s2660_s29 = smov 96   ;;  %s2661_s28 = smov 64  }
  0x20   : > { %2369 = vmatprep.mubr.msk.bf16.mxu1 %vm2656_vm2, %v2655_v17  ;;  %v2243_v36 = vld [vmem:[%s3170_s24] ss:$0 sm:$0xff]  ;;  %s3171_s16 = sld [smem:[#allocation7_spill]]  ;;  %s2662_s17 = smov 8  }
  0x21   : > { %s2663_s14 = smov 16   ;;  %s2664_s18 = smov 24  }
  0x22   : > { %2350 = vmatpush3.bf16.msra.mxu0 %v2554_v18  ;;  %s3172_s24 = scalar_lea.vmem %s3147_s6, %s2756_s15  ;;  %p2282_p5 = scmp.ne.s32.totalorder %s2750_s30, 1 }
  0x23   : > { %645 = vadd.xlane.f32.xlu0 %v644_v5  ;;  %2355 = vmatprep.subr.bf16.mxu0 %v2655_v17  ;;  %vm2666_vm7 = vmmov (!%p2282_p5), 0  }
  0xac   : > { %v643_v6 = vpop.xlane.xlu0 %642 }
  0xad   : > { %v648_v7 = vmul.f32 0.03125, %v643_v6 }
  0xaf   : > { %v650_v8 = vsub.f32 %v2819_v2, %v648_v7 }
  0xb0   : > { %v646_v9 = vpop.xlane.xlu0 %645 }
  0xb1   : > { %v649_v10 = vmul.f32 0.03125, %v646_v9  ;;  %v652_v11 = vmul.f32 %v650_v8, %v650_v8 }
  0xb3   : > { %v651_v12 = vsub.f32 %v2821_v3, %v649_v10  ;;  %v654_v13 = vsel %vm640_vm1, %v652_v11, 0.0 }
  0xb4   : > { %655 = vadd.xlane.f32.xlu1 %v654_v13 }
  0xb5   : > { %v653_v14 = vmul.f32 %v651_v12, %v651_v12 }
  0xb7   : > { %v657_v15 = vsel %vm640_vm1, %v653_v14, 0.0 }
  0xb8   : > { %658 = vadd.xlane.f32.xlu1 %v657_v15 }
 0x141   : > { %v656_v19 = vpop.xlane.xlu1 %655 }
 0x142   : > { %v660_v20 = vmul.f32 0.03125, %v656_v19 }
 0x144   : > { %v662_v21 = vadd.f32 1e-05, %v660_v20 }
 0x145   : > { %v659_v22 = vpop.xlane.xlu1 %658 }
 0x146   : > { %2567 = vrsqrt.f32 %v662_v21  ;;  %v661_v23 = vmul.f32 0.03125, %v659_v22 }
 0x148   : > { %v663_v24 = vadd.f32 1e-05, %v661_v23 }
 0x14a   : > { %2569 = vrsqrt.f32 %v663_v24 }
 0x150   : > { %v2568_v25 = vpop.eup %2567 }
 0x151   : > { %v666_v26 = vmul.f32 %v2568_v25, %v650_v8 }
 0x153   : > { %v674_v30 = vmul.f32 %v2241_v27, %v666_v26 }
 0x154   : > { %v2570_v28 = vpop.eup %2569 }
 0x155   : > { %v667_v29 = vmul.f32 %v2570_v28, %v651_v12  ;;  %v682_v33 = vadd.f32 %v2242_v31, %v674_v30 }
 0x157   : > { %v675_v32 = vmul.f32 %v2241_v27, %v667_v29 }
 0x159   : > { %v683_v34 = vadd.f32 %v2242_v31, %v675_v32 }
 0x15b   : > { %v684_v35 = vpack.c.bf16 %v683_v34, %v682_v33 }
 0x15d   : > { %2352 = vmatmul.mubr.msk.bf16.vlgmr.msra.gmra.mrb[0].mxu0 %vm640_vm1, %v684_v35 }
 0x15e   : > { %2357 = vmatprep.mubr.msk.bf16.mxu0 %vm2656_vm2, %v2655_v17 }
 0x230   : > { %v745_v37 = vpop.f32.mrb[0].mxu0 }
 0x231   : > { %v2353_v38 = vpop.f32.mrb[1].mxu0  ;;  %v746_v40 = vadd.f32 %v2243_v36, %v745_v37 }
 0x232   : > { %v748_v39 = vpop.f32.mrb[2].mxu0 }
 0x233   : > { %v749_v41 = vadd.f32 %v2243_v36, %v748_v39  ;;  %v2354_v42 = vpop.f32.mrb[3].mxu0  ;;  %v772_v45 = vpack.c.bf16 %v746_v40, %v746_v40 }
 0x235   : > { %v2528_v43 = vpack.i.bf16 %v749_v41, %v746_v40  ;;  %v2859_v44 = vpack.c.bf16 %v749_v41, %v749_v41 }
 0x237   : > { %2529 = vrot.lane.b32.xlu1 %v2528_v43, %s2657_s22  ;;  %2524 = vrot.lane.b32.xlu0 %v2528_v43, %s2658_s26 }
 0x23b   : > { %2534 = vrot.lane.b32.xlu1 %v2528_v43, %s2659_s27  ;;  %831 = vrot.lane.b32.xlu0 %v2859_v44, %s2660_s29 }
 0x23f   : > { %781 = vrot.lane.b32.xlu1 %v772_v45, %s2660_s29 }
 0x2a9   : > { %v2530_v46 = vpop.permute.xlu1 %2529  ;;  %v2525_v47 = vpop.permute.xlu0 %2524 }
 0x2aa   : > { %v2527_v48 = vunpack.i.h.bf16 %v2525_v47  ;;  %v2526_v49 = vunpack.i.l.bf16 %v2525_v47  ;;  %v2532_v50 = vunpack.i.h.bf16 %v2530_v46  ;;  %v2531_v51 = vunpack.i.l.bf16 %v2530_v46 }
 0x2ac   : > { %v2862_v52 = vpack.c.bf16 %v2527_v48, %v2527_v48  ;;  %v2864_v53 = vpack.c.bf16 %v2526_v49, %v2526_v49  ;;  %v2868_v55 = vpack.c.bf16 %v2532_v50, %v2532_v50  ;;  %v2870_v56 = vpack.c.bf16 %v2531_v51, %v2531_v51 }
 0x2ad   : > { %v2535_v54 = vpop.permute.xlu1 %2534  ;;  %v832_v63 = vpop.permute.xlu0 %831 }
 0x2ae   : > { %880 = vrot.lane.b32.xlu1 %v2864_v53, %s2660_s29  ;;  %929 = vrot.lane.b32.xlu0 %v2862_v52, %s2660_s29  ;;  %v2537_v57 = vunpack.i.h.bf16 %v2535_v54  ;;  %v2536_v58 = vunpack.i.l.bf16 %v2535_v54  ;;  %v837_v0 = vsel %vm783_vm3, %v832_v63, 0 }
 0x2b0   : > { %v2875_v61 = vpack.c.bf16 %v2537_v57, %v2537_v57  ;;  %v2877_v62 = vpack.c.bf16 %v2536_v58, %v2536_v58 }
 0x2b1   : > { %v782_v59 = vpop.permute.xlu1 %781 }
 0x2b2   : > { %v788_v60 = vsel %vm783_vm3, %v782_v59, 0  ;;  %978 = vrot.lane.b32.xlu1 %v2870_v56, %s2660_s29  ;;  %1027 = vrot.lane.b32.xlu0 %v2868_v55, %s2660_s29 }
 0x2b3   : > { %2356 = vmatpush3.bf16.xpose.msra.mxu0 %v788_v60 }
 0x2b4   : > { %2361 = vmatprep.subr.bf16.mxu0 %v2655_v17 }
 0x2b6   : > { %1076 = vrot.lane.b32.xlu1 %v2877_v62, %s2660_s29  ;;  %1125 = vrot.lane.b32.xlu0 %v2875_v61, %s2660_s29 }
 0x2ba   : > { %2358 = vmatmul.mubr.msk.bf16.vlgmr.msra.gmra.mrb[4].mxu0 %vm783_vm3, %v772_v45  ;;  %1269 = vrot.lane.b32.xlu1 %v772_v45, %s2661_s28 }
 0x2bb   : > { %2362 = vmatpush3.bf16.xpose.msra.mxu0 %v837_v0  ;;  %2363 = vmatprep.mubr.msk.bf16.mxu0 %vm2656_vm2, %v2655_v17 }
 0x2bc   : > { %2373 = vmatprep.subr.bf16.mxu0 %v2655_v17 }
 0x2c2   : > { %2364 = vmatmul.mubr.msk.bf16.vlgmr.msra.gmra.mrb[8].mxu0 %vm783_vm3, %v2859_v44 }
 0x2c3   : > { %2375 = vmatprep.mubr.msk.bf16.mxu0 %vm2656_vm2, %v2655_v17 }
 0x320   : > { %v881_v1 = vpop.permute.xlu1 %880  ;;  %v930_v4 = vpop.permute.xlu0 %929 }
 0x321   : > { %v935_v5 = vsel %vm783_vm3, %v930_v4, 0  ;;  %v886_v6 = vsel %vm783_vm3, %v881_v1, 0 }
 0x322   : > { %2368 = vmatpush3.bf16.xpose.msra.mxu1 %v886_v6  ;;  %2374 = vmatpush3.bf16.xpose.msra.mxu0 %v935_v5 }
 0x323   : > { %2379 = vmatprep.subr.bf16.mxu1 %v2655_v17  ;;  %2385 = vmatprep.subr.bf16.mxu0 %v2655_v17 }
 0x324   : > { %v979_v7 = vpop.permute.xlu1 %978  ;;  %v1028_v8 = vpop.permute.xlu0 %1027 }
 0x325   : > { %v984_v9 = vsel %vm783_vm3, %v979_v7, 0  ;;  %v1033_v10 = vsel %vm783_vm3, %v1028_v8, 0 }
 0x328   : > { %v1077_v11 = vpop.permute.xlu1 %1076  ;;  %v1126_v12 = vpop.permute.xlu0 %1125 }
 0x329   : > { %2370 = vmatmul.mubr.msk.bf16.vlgmr.msra.gmra.mrb[0].mxu1 %vm783_vm3, %v2864_v53  ;;  %2376 = vmatmul.mubr.msk.bf16.vlgmr.msra.gmra.mrb[12].mxu0 %vm783_vm3, %v2862_v52  ;;  %v1082_v13 = vsel %vm783_vm3, %v1077_v11, 0  ;;  %v1131_v14 = vsel %vm783_vm3, %v1126_v12, 0 }
 0x32a   : > { %2380 = vmatpush3.bf16.xpose.msra.mxu1 %v984_v9  ;;  %2386 = vmatpush3.bf16.xpose.msra.mxu0 %v1033_v10 }
 0x32b   : > { %2381 = vmatprep.mubr.msk.bf16.mxu1 %vm2656_vm2, %v2655_v17  ;;  %2387 = vmatprep.mubr.msk.bf16.mxu0 %vm2656_vm2, %v2655_v17 }
 0x32c   : > { %2391 = vmatprep.subr.bf16.mxu1 %v2655_v17  ;;  %2397 = vmatprep.subr.bf16.mxu0 %v2655_v17  ;;  %v1270_v15 = vpop.permute.xlu1 %1269 }
 0x32d   : > { %v1276_v16 = vsel %vm1274_vm4, %v1270_v15, 0 }
 0x331   : > { %2382 = vmatmul.mubr.msk.bf16.vlgmr.msra.gmra.mrb[4].mxu1 %vm783_vm3, %v2870_v56  ;;  %2388 = vmatmul.mubr.msk.bf16.vlgmr.msra.gmra.mrb[16].mxu0 %vm783_vm3, %v2868_v55 }
 0x332   : > { %2392 = vmatpush3.bf16.xpose.msra.mxu1 %v1082_v13  ;;  %2398 = vmatpush3.bf16.xpose.msra.mxu0 %v1131_v14 }
 0x333   : > { %2393 = vmatprep.mubr.msk.bf16.mxu1 %vm2656_vm2, %v2655_v17  ;;  %2399 = vmatprep.mubr.msk.bf16.mxu0 %vm2656_vm2, %v2655_v17 }
 0x334   : > { %2403 = vmatprep.subr.bf16.mxu1 %v2655_v17  ;;  %2409 = vmatprep.subr.bf16.mxu0 %v2655_v17 }
 0x339   : > { %2394 = vmatmul.mubr.msk.bf16.vlgmr.msra.gmra.mrb[8].mxu1 %vm783_vm3, %v2877_v62  ;;  %2400 = vmatmul.mubr.msk.bf16.vlgmr.msra.gmra.mrb[20].mxu0 %vm783_vm3, %v2875_v61 }
 0x33a   : > { %2404 = vmatpush3.bf16.msra.mxu1 %v1276_v16  ;;  %2411 = vmatprep.mubr.msk.bf16.mxu0 %vm2656_vm2, %v2655_v17 }
 0x33b   : > { %2405 = vmatprep.mubr.msk.bf16.mxu1 %vm2656_vm2, %v2655_v17  ;;  %2415 = vmatprep.subr.bf16.mxu1 %v2655_v17 }
 0x38d   : > { %v824_v18 = vpop.f32.mrb[4].mxu0 }
 0x38e   : > { %v2359_v19 = vpop.f32.mrb[5].mxu0  ;;  %v1173_v20 = vsel %vm783_vm3, %v824_v18, -inf }
 0x38f   : > { %1174 = vmax.xlane.f32.xlu1 %v1173_v20  ;;  %v827_v21 = vpop.f32.mrb[6].mxu0 }
 0x390   : > { %v2360_v22 = vpop.f32.mrb[7].mxu0 }
 0x395   : > { %v873_v23 = vpop.f32.mrb[8].mxu0 }
 0x396   : > { %v2365_v24 = vpop.f32.mrb[9].mxu0  ;;  %v1176_v25 = vsel %vm783_vm3, %v873_v23, -inf }
 0x397   : > { %1177 = vmax.xlane.f32.xlu0 %v1176_v25  ;;  %v876_v26 = vpop.f32.mrb[10].mxu0 }
 0x398   : > { %v2366_v27 = vpop.f32.mrb[11].mxu0 }
 0x3fc   : > { %v922_v28 = vpop.f32.mrb[0].mxu1  ;;  %v971_v29 = vpop.f32.mrb[12].mxu0 }
 0x3fd   : > { %v2371_v30 = vpop.f32.mrb[1].mxu1  ;;  %v2377_v31 = vpop.f32.mrb[13].mxu0  ;;  %v1179_v32 = vsel %vm783_vm3, %v922_v28, -inf  ;;  %v1182_v37 = vsel %vm783_vm3, %v971_v29, -inf }
 0x3fe   : > { %v925_v33 = vpop.f32.mrb[2].mxu1  ;;  %1180 = vmax.xlane.f32.xlu0 %v1179_v32  ;;  %v974_v34 = vpop.f32.mrb[14].mxu0 }
 0x3ff   : > { %v2372_v35 = vpop.f32.mrb[3].mxu1  ;;  %v2378_v36 = vpop.f32.mrb[15].mxu0 }
 0x402   : > { %1183 = vmax.xlane.f32.xlu0 %v1182_v37 }
 0x404   : > { %v1020_v38 = vpop.f32.mrb[4].mxu1  ;;  %v2934_v39 = vpop.f32.mrb[16].mxu0 }
 0x405   : > { %v2383_v40 = vpop.f32.mrb[5].mxu1  ;;  %v2389_v41 = vpop.f32.mrb[17].mxu0  ;;  %v1185_v42 = vsel %vm783_vm3, %v1020_v38, -inf  ;;  %v1188_v43 = vsel %vm783_vm3, %v2934_v39, -inf }
 0x406   : > { %v1023_v45 = vpop.f32.mrb[6].mxu1  ;;  %1186 = vmax.xlane.f32.xlu1 %v1185_v42  ;;  %1189 = vmax.xlane.f32.xlu0 %v1188_v43  ;;  %v1072_v46 = vpop.f32.mrb[18].mxu0 }
 0x407   : > { %v2384_v47 = vpop.f32.mrb[7].mxu1  ;;  %v2390_v48 = vpop.f32.mrb[19].mxu0 }
 0x40c   : > { %v1118_v49 = vpop.f32.mrb[8].mxu1  ;;  %v2939_v50 = vpop.f32.mrb[20].mxu0 }
 0x40d   : > { %v2395_v51 = vpop.f32.mrb[9].mxu1  ;;  %v2401_v54 = vpop.f32.mrb[21].mxu0  ;;  %v1191_v57 = vsel %vm783_vm3, %v1118_v49, -inf  ;;  %v1194_v58 = vsel %vm783_vm3, %v2939_v50, -inf }
 0x40e   : > { %v1121_v59 = vpop.f32.mrb[10].mxu1  ;;  %1192 = vmax.xlane.f32.xlu1 %v1191_v57  ;;  %1195 = vmax.xlane.f32.xlu0 %v1194_v58  ;;  %v1170_v60 = vpop.f32.mrb[22].mxu0 }
 0x40f   : > { %v2396_v63 = vpop.f32.mrb[11].mxu1  ;;  %v2402_v0 = vpop.f32.mrb[23].mxu0 }
 0x41c   : > { %v1175_v5 = vpop.xlane.xlu1 %1174 }
 0x41d   : > { %v1197_v6 = vsub.f32 %v824_v18, %v1175_v5 }
 0x41f   : > { %1366 = vrot.lane.b32.xlu1 %v2864_v53, %s2661_s28  ;;  %v1205_v8 = vmul.f32 1.442695, %v1197_v6 }
 0x423   : > { %1414 = vrot.lane.b32.xlu1 %v2862_v52, %s2661_s28 }
 0x424   : > { %1318 = vrot.lane.b32.xlu0 %v2859_v44, %s2661_s28  ;;  %v1178_v1 = vpop.xlane.xlu0 %1177 }
 0x425   : > { %v1198_v4 = vsub.f32 %v873_v23, %v1178_v1 }
 0x427   : > { %v1207_v7 = vmul.f32 1.442695, %v1198_v4 }
 0x429   : > { %2571 = vpow2.f32 %v1207_v7 }
 0x42a   : > { %2573 = vpow2.f32 %v1205_v8 }
 0x433   : > { %v2572_v9 = vpop.eup %2571 }
 0x434   : > { %v1224_v10 = vsel %vm783_vm3, %v2572_v9, 0.0  ;;  %v2951_v11 = vpop.eup %2573 }
 0x435   : > { %v1221_v52 = vsel %vm783_vm3, %v2951_v11, 0.0 }
 0x443   : > { %1225 = vadd.xlane.f32.xlu0 %v1224_v10 }
 0x447   : > { %1222 = vadd.xlane.f32.xlu1 %v1221_v52 }
 0x458   : > { %1462 = vrot.lane.b32.xlu1 %v2870_v56, %s2661_s28 }
 0x48b   : > { %v1181_v44 = vpop.xlane.xlu0 %1180 }
 0x48c   : > { %v1199_v53 = vsub.f32 %v922_v28, %v1181_v44 }
 0x48e   : > { %v1209_v12 = vmul.f32 1.442695, %v1199_v53 }
 0x48f   : > { %v1184_v13 = vpop.xlane.xlu0 %1183 }
 0x490   : > { %2575 = vpow2.f32 %v1209_v12  ;;  %v1200_v14 = vsub.f32 %v971_v29, %v1184_v13 }
 0x492   : > { %v1211_v15 = vmul.f32 1.442695, %v1200_v14 }
 0x493   : > { %v1187_v16 = vpop.xlane.xlu1 %1186  ;;  %v1190_v20 = vpop.xlane.xlu0 %1189 }
 0x494   : > { %2577 = vpow2.f32 %v1211_v15  ;;  %v1201_v18 = vsub.f32 %v1020_v38, %v1187_v16  ;;  %v1202_v34 = vsub.f32 %v2934_v39, %v1190_v20 }
 0x496   : > { %v1213_v19 = vmul.f32 1.442695, %v1201_v18  ;;  %v1215_v35 = vmul.f32 1.442695, %v1202_v34 }
 0x498   : > { %2579 = vpow2.f32 %v1213_v19 }
 0x49a   : > { %v2957_v21 = vpop.eup %2575 }
 0x49b   : > { %v1193_v22 = vpop.xlane.xlu1 %1192  ;;  %v1196_v23 = vpop.xlane.xlu0 %1195  ;;  %v1227_v56 = vsel %vm783_vm3, %v2957_v21, 0.0 }
 0x49c   : > { %v1203_v24 = vsub.f32 %v1118_v49, %v1193_v22  ;;  %1228 = vadd.xlane.f32.xlu1 %v1227_v56  ;;  %v1204_v36 = vsub.f32 %v2939_v50, %v1196_v23 }
 0x49e   : > { %v2961_v25 = vpop.eup %2577  ;;  %v1217_v26 = vmul.f32 1.442695, %v1203_v24  ;;  %v1219_v37 = vmul.f32 1.442695, %v1204_v36 }
 0x49f   : > { %v1319_v27 = vpop.permute.xlu0 %1318  ;;  %v1230_v28 = vsel %vm783_vm3, %v2961_v25, 0.0  ;;  %v1367_v38 = vpop.permute.xlu1 %1366 }
 0x4a0   : > { %2581 = vpow2.f32 %v1217_v26  ;;  %v1324_v29 = vsel %vm1274_vm4, %v1319_v27, 0  ;;  %1231 = vadd.xlane.f32.xlu0 %v1230_v28  ;;  %v1372_v54 = vsel %vm1274_vm4, %v1367_v38, 0 }
 0x4a1   : > { %2410 = vmatpush3.bf16.msra.mxu0 %v1324_v29  ;;  %2583 = vpow2.f32 %v1215_v35 }
 0x4a2   : > { %v2966_v30 = vpop.eup %2579  ;;  %2421 = vmatprep.subr.bf16.mxu0 %v2655_v17  ;;  %2585 = vpow2.f32 %v1219_v37 }
 0x4a3   : > { %v1233_v31 = vsel %vm783_vm3, %v2966_v30, 0.0  ;;  %v1415_v40 = vpop.permute.xlu1 %1414 }
 0x4a4   : > { %1234 = vadd.xlane.f32.xlu1 %v1233_v31  ;;  %v1420_v49 = vsel %vm1274_vm4, %v1415_v40, 0 }
 0x4aa   : > { %v2971_v32 = vpop.eup %2581 }
 0x4ab   : > { %v1239_v33 = vsel %vm783_vm3, %v2971_v32, 0.0  ;;  %v2981_v42 = vpop.eup %2583 }
 0x4ac   : > { %1240 = vadd.xlane.f32.xlu1 %v1239_v33  ;;  %v2985_v45 = vpop.eup %2585 }
 0x4b6   : > { %1510 = vrot.lane.b32.xlu0 %v2868_v55, %s2661_s28  ;;  %v1236_v55 = vsel %vm783_vm3, %v2981_v42, 0.0 }
 0x4bd   : > { %1558 = vrot.lane.b32.xlu1 %v2877_v62, %s2661_s28  ;;  %v1242_v62 = vsel %vm783_vm3, %v2985_v45, 0.0 }
 0x4d0   : > { %v1226_v41 = vpop.xlane.xlu0 %1225 }
 0x4d1   : > { %2587 = vrcp.f32 %v1226_v41 }
 0x4d4   : > { %v1223_v43 = vpop.xlane.xlu1 %1222 }
 0x4d5   : > { %2589 = vrcp.f32 %v1223_v43  ;;  %1237 = vadd.xlane.f32.xlu0 %v1236_v55 }
 0x4d8   : > { %v1463_v57 = vpop.permute.xlu1 %1462 }
 0x4d9   : > { %1243 = vadd.xlane.f32.xlu0 %v1242_v62  ;;  %v1468_v5 = vsel %vm1274_vm4, %v1463_v57, 0 }
 0x4db   : > { %v2588_v39 = vpop.eup %2587 }
 0x4dc   : > { %v1254_v46 = vmul.f32 %v2588_v39, %v2572_v9 }
 0x4de   : > { %v1262_v47 = vpack.c.bf16 %v1254_v46, %v1254_v46 }
 0x4df   : > { %v2590_v48 = vpop.eup %2589 }
 0x4e0   : > { %v1253_v50 = vmul.f32 %v2590_v48, %v2951_v11  ;;  %2412 = vmatmul.mubr.msk.bf16.vlgmr.msra.gmra.mrb[24].mxu0 %vm783_vm3, %v1262_v47 }
 0x4e1   : > { %2422 = vmatpush3.bf16.msra.mxu0 %v1420_v49  ;;  %2423 = vmatprep.mubr.msk.bf16.mxu0 %vm2656_vm2, %v2655_v17  ;;  %v2555_v49 = vld [vmem:[%s3171_s16] sm:$0xff]  }
 0x4e2   : > { %v1261_v51 = vpack.c.bf16 %v1253_v50, %v1253_v50  ;;  %2433 = vmatprep.subr.bf16.mxu0 %v2655_v17  ;;  %v2556_v50 = vld [vmem:[%s3171_s16 + $0x8] sm:$0xff]  }
 0x4e4   : > { %2406 = vmatmul.mubr.msk.bf16.vlgmr.msra.gmra.mrb[12].mxu1 %vm783_vm3, %v1261_v51 }
 0x4e5   : > { %2416 = vmatpush3.bf16.msra.mxu1 %v1372_v54  ;;  %2417 = vmatprep.mubr.msk.bf16.mxu1 %vm2656_vm2, %v2655_v17 }
 0x4e6   : > { %2427 = vmatprep.subr.bf16.mxu1 %v2655_v17 }
 0x4ef   : > { %1606 = vrot.lane.b32.xlu0 %v2875_v61, %s2661_s28 }
 0x529   : > { %v1229_v58 = vpop.xlane.xlu1 %1228 }
 0x52a   : > { %2591 = vrcp.f32 %v1229_v58 }
 0x52d   : > { %v1232_v59 = vpop.xlane.xlu0 %1231 }
 0x52e   : > { %2593 = vrcp.f32 %v1232_v59 }
 0x531   : > { %v1235_v60 = vpop.xlane.xlu1 %1234  ;;  %v1511_v61 = vpop.permute.xlu0 %1510 }
 0x532   : > { %2595 = vrcp.f32 %v1235_v60  ;;  %v1516_v11 = vsel %vm1274_vm4, %v1511_v61, 0 }
 0x534   : > { %v2592_v63 = vpop.eup %2591 }
 0x535   : > { %v1255_v0 = vmul.f32 %v2592_v63, %v2957_v21 }
 0x537   : > { %v1263_v1 = vpack.c.bf16 %v1255_v0, %v1255_v0 }
 0x538   : > { %v2594_v4 = vpop.eup %2593 }
 0x539   : > { %v1256_v6 = vmul.f32 %v2594_v4, %v2961_v25  ;;  %2418 = vmatmul.mubr.msk.bf16.vlgmr.msra.gmra.mrb[16].mxu1 %vm783_vm3, %v1263_v1  ;;  %v1241_v7 = vpop.xlane.xlu1 %1240 }
 0x53a   : > { %2428 = vmatpush3.bf16.msra.mxu1 %v1468_v5  ;;  %2597 = vrcp.f32 %v1241_v7  ;;  %2429 = vmatprep.mubr.msk.bf16.mxu1 %vm2656_vm2, %v2655_v17 }
 0x53b   : > { %v1264_v8 = vpack.c.bf16 %v1256_v6, %v1256_v6  ;;  %2439 = vmatprep.subr.bf16.mxu1 %v2655_v17 }
 0x53c   : > { %v2596_v9 = vpop.eup %2595 }
 0x53d   : > { %v1257_v10 = vmul.f32 %v2596_v9, %v2966_v30  ;;  %2424 = vmatmul.mubr.msk.bf16.vlgmr.msra.gmra.mrb[28].mxu0 %vm783_vm3, %v1264_v8  ;;  %v1559_v52 = vpop.permute.xlu1 %1558 }
 0x53e   : > { %2434 = vmatpush3.bf16.msra.mxu0 %v1516_v11  ;;  %2435 = vmatprep.mubr.msk.bf16.mxu0 %vm2656_vm2, %v2655_v17  ;;  %v1564_v53 = vsel %vm1274_vm4, %v1559_v52, 0 }
 0x53f   : > { %v1265_v44 = vpack.c.bf16 %v1257_v10, %v1257_v10  ;;  %2445 = vmatprep.subr.bf16.mxu0 %v2655_v17 }
 0x541   : > { %2430 = vmatmul.mubr.msk.bf16.vlgmr.msra.gmra.mrb[20].mxu1 %vm783_vm3, %v1265_v44 }
 0x542   : > { %2440 = vmatpush3.bf16.msra.mxu1 %v1564_v53  ;;  %2441 = vmatprep.mubr.msk.bf16.mxu1 %vm2656_vm2, %v2655_v17 }
 0x543   : > { %2451 = vmatprep.subr.bf16.mxu1 %v2655_v17 }
 0x544   : > { %v2598_v12 = vpop.eup %2597 }
 0x545   : > { %v1259_v13 = vmul.f32 %v2598_v12, %v2971_v32 }
 0x547   : > { %v1267_v14 = vpack.c.bf16 %v1259_v13, %v1259_v13 }
 0x549   : > { %2442 = vmatmul.mubr.msk.bf16.vlgmr.msra.gmra.mrb[24].mxu1 %vm783_vm3, %v1267_v14 }
 0x54a   : > { %2455 = vmatprep.mubr.msk.bf16.mxu1 %vm2656_vm2, %v2655_v17  ;;  %2452 = vmatpush3.bf16.msra.mxu1 %v2555_v49  ;;  %v2268_v49 = vld [vmem:[%s609_s25] ss:$0 sm:$0xff] }
 0x54b   : > { %2453 = vmatprep.subr.bf16.mxu1 %v2655_v17 }
 0x54e   : > { %2454 = vmatpush3.bf16.msra.mxu1 %v2556_v50 }
 0x54f   : > { %2467 = vmatprep.subr.bf16.mxu1 %v2655_v17 }
 0x562   : > { %v1238_v15 = vpop.xlane.xlu0 %1237 }
 0x563   : > { %2599 = vrcp.f32 %v1238_v15 }
 0x566   : > { %v1244_v16 = vpop.xlane.xlu0 %1243 }
 0x567   : > { %2601 = vrcp.f32 %v1244_v16 }
 0x56a   : > { %v1607_v20 = vpop.permute.xlu0 %1606 }
 0x56b   : > { %v1612_v23 = vsel %vm1274_vm4, %v1607_v20, 0 }
 0x56d   : > { %v2600_v18 = vpop.eup %2599 }
 0x56e   : > { %v1258_v19 = vmul.f32 %v2600_v18, %v2981_v42  ;;  %v2263_v18 = vld [vmem:[%s3172_s24] ss:$0 sm:$0xff] }
 0x570   : > { %v1266_v21 = vpack.c.bf16 %v1258_v19, %v1258_v19 }
 0x571   : > { %v2602_v22 = vpop.eup %2601 }
 0x572   : > { %2436 = vmatmul.mubr.msk.bf16.vlgmr.msra.gmra.mrb[32].mxu0 %vm783_vm3, %v1266_v21  ;;  %v1260_v56 = vmul.f32 %v2602_v22, %v2985_v45 }
 0x573   : > { %2446 = vmatpush3.bf16.msra.mxu0 %v1612_v23  ;;  %2447 = vmatprep.mubr.msk.bf16.mxu0 %vm2656_vm2, %v2655_v17 }
 0x574   : > { %2459 = vmatprep.subr.bf16.mxu0 %v2655_v17  ;;  %v1268_v24 = vpack.c.bf16 %v1260_v56, %v1260_v56 }
 0x57a   : > { %2448 = vmatmul.mubr.msk.bf16.vlgmr.msra.gmra.mrb[36].mxu0 %vm783_vm3, %v1268_v24 }
 0x57b   : > { %2463 = vmatprep.mubr.msk.bf16.mxu0 %vm2656_vm2, %v2655_v17 }
 0x5b3   : > { %v1360_v25 = vpop.f32.mrb[24].mxu0 }
 0x5b4   : > { %v2413_v26 = vpop.f32.mrb[25].mxu0 }
 0x5b5   : > { %v1363_v27 = vpop.f32.mrb[26].mxu0 }
 0x5b6   : > { %v2414_v28 = vpop.f32.mrb[27].mxu0 }
 0x5b7   : > { %v1312_v29 = vpop.f32.mrb[12].mxu1 }
 0x5b8   : > { %v2407_v30 = vpop.f32.mrb[13].mxu1 }
 0x5b9   : > { %v1315_v31 = vpop.f32.mrb[14].mxu1 }
 0x5ba   : > { %v2408_v32 = vpop.f32.mrb[15].mxu1 }
 0x60c   : > { %v1408_v33 = vpop.f32.mrb[16].mxu1 }
 0x60d   : > { %v2419_v34 = vpop.f32.mrb[17].mxu1 }
 0x60e   : > { %v1411_v35 = vpop.f32.mrb[18].mxu1 }
 0x60f   : > { %v2420_v36 = vpop.f32.mrb[19].mxu1 }
 0x610   : > { %v1456_v37 = vpop.f32.mrb[28].mxu0  ;;  %v2557_v36 = vld [vmem:[%s2796_s3] sm:$0xff]  }
 0x611   : > { %v2538_v38 = vpack.i.bf16 %v1456_v37, %v1408_v33  ;;  %v2425_v40 = vpop.f32.mrb[29].mxu0  ;;  %2460 = vmatpush3.bf16.msra.mxu0 %v2557_v36  ;;  %v2558_v37 = vld [vmem:[%s2796_s3 + $0x8] sm:$0xff]  }
 0x612   : > { %v1459_v41 = vpop.f32.mrb[30].mxu0  ;;  %2461 = vmatprep.subr.bf16.mxu0 %v2655_v17 }
 0x613   : > { %2539 = vrot.lane.b32.xlu1 %v2538_v38, %s2662_s17  ;;  %v2426_v42 = vpop.f32.mrb[31].mxu0 }
 0x614   : > { %v1504_v43 = vpop.f32.mrb[20].mxu1 }
 0x615   : > { %v2431_v55 = vpop.f32.mrb[21].mxu1  ;;  %2462 = vmatpush3.bf16.msra.mxu0 %v2558_v37  ;;  %v2665_v37 = vmov (!%p2282_p5), 0.0  }
 0x616   : > { %v1507_v45 = vpop.f32.mrb[22].mxu1  ;;  %2487 = vmatprep.subr.bf16.mxu0 (!%p2282_p5), %v2665_v37 }
 0x617   : > { %v2432_v62 = vpop.f32.mrb[23].mxu1 }
 0x61c   : > { %v1600_v39 = vpop.f32.mrb[24].mxu1 }
 0x61d   : > { %v2443_v46 = vpop.f32.mrb[25].mxu1 }
 0x61e   : > { %v1603_v47 = vpop.f32.mrb[26].mxu1 }
 0x61f   : > { %v2444_v48 = vpop.f32.mrb[27].mxu1 }
 0x645   : > { %v1552_v51 = vpop.f32.mrb[32].mxu0 }
 0x646   : > { %v2543_v54 = vpack.i.bf16 %v1552_v51, %v1504_v43  ;;  %v2437_v57 = vpop.f32.mrb[33].mxu0 }
 0x647   : > { %v1555_v58 = vpop.f32.mrb[34].mxu0 }
 0x648   : > { %2544 = vrot.lane.b32.xlu0 %v2543_v54, %s2663_s14  ;;  %v2438_v59 = vpop.f32.mrb[35].mxu0  ;;  %v2559_v58 = vld [vmem:[%s2806_s19] sm:$0xff]  }
 0x649   : > { %v2560_v59 = vld [vmem:[%s2806_s19 + $0x8] sm:$0xff]  }
 0x64d   : > { %v1648_v60 = vpop.f32.mrb[36].mxu0 }
 0x64e   : > { %v2548_v63 = vpack.i.bf16 %v1648_v60, %v1600_v39  ;;  %v2449_v0 = vpop.f32.mrb[37].mxu0  ;;  %v2267_v39 = vld [vmem:[%s606_s13] ss:$0 sm:$0xff]  ;;  %v2561_v60 = vld [vmem:[%s2806_s19 + $0x10] sm:$0xff]  }
 0x64f   : > { %v1651_v1 = vpop.f32.mrb[38].mxu0  ;;  %v2563_v0 = vld [vmem:[%s2806_s19 + $0x20] sm:$0xff]  }
 0x650   : > { %2549 = vrot.lane.b32.xlu1 %v2548_v63, %s2664_s18  ;;  %v2450_v4 = vpop.f32.mrb[39].mxu0  ;;  %v2562_v63 = vld [vmem:[%s2806_s19 + $0x18] sm:$0xff]   ;;  %v2564_v1 = vld [vmem:[%s2806_s19 + $0x28] sm:$0xff]  }
 0x651   : > { %v2565_v4 = vld [vmem:[%s2806_s19 + $0x30] sm:$0xff]  }
 0x685   : > { %v2540_v5 = vpop.permute.xlu1 %2539 }
 0x686   : > { %v2542_v7 = vunpack.i.h.bf16 %v2540_v5  ;;  %v2541_v61 = vunpack.i.l.bf16 %v2540_v5  ;;  %v2566_v5 = vld [vmem:[%s2806_s19 + $0x38] sm:$0xff]  }
 0x688   : > { %v1683_v11 = vsel %vm783_vm3, %v1360_v25, %v2542_v7  ;;  %v1666_v52 = vsel %vm783_vm3, %v1312_v29, %v2541_v61 }
 0x6ba   : > { %v2545_v6 = vpop.permute.xlu0 %2544 }
 0x6bb   : > { %v2547_v8 = vunpack.i.h.bf16 %v2545_v6  ;;  %v2546_v9 = vunpack.i.l.bf16 %v2545_v6  ;;  %v2269_v6 = vld [vmem:[%s617_s5] ss:$0 sm:$0xff] }
 0x6bd   : > { %v1684_v12 = vsel %vm1667_vm5, %v1683_v11, %v2547_v8  ;;  %v1668_v13 = vsel %vm1667_vm5, %v1666_v52, %v2546_v9 }
 0x6c2   : > { %v2550_v10 = vpop.permute.xlu1 %2549 }
 0x6c3   : > { %v2552_v44 = vunpack.i.h.bf16 %v2550_v10  ;;  %v2551_v53 = vunpack.i.l.bf16 %v2550_v10 }
 0x6c5   : > { %v1685_v14 = vsel %vm1669_vm6, %v1684_v12, %v2552_v44  ;;  %v1670_v15 = vsel %vm1669_vm6, %v1668_v13, %v2551_v53 }
 0x6c6   : > { %v1686_v16 = vpack.c.bf16 %v1685_v14, %v1670_v15 }
 0x6c8   : > { %2456 = vmatmul.mubr.msk.bf16.vlgmr.msra.gmra.mrb[28].mxu1 %vm640_vm1, %v1686_v16 }
 0x6c9   : > { %2483 = vmatprep.mubr.msk.bf16.mxu1 %vm2656_vm2, %v2655_v17  ;;  %2468 = vmatpush3.bf16.msra.mxu1 %v2559_v58 }
 0x6ca   : > { %2469 = vmatprep.subr.bf16.mxu1 %v2655_v17 }
 0x6cd   : > { %2470 = vmatpush3.bf16.msra.mxu1 %v2560_v59 }
 0x6ce   : > { %2471 = vmatprep.subr.bf16.mxu1 %v2655_v17 }
 0x6d1   : > { %2472 = vmatpush3.bf16.msra.mxu1 %v2561_v60 }
 0x6d2   : > { %2473 = vmatprep.subr.bf16.mxu1 %v2655_v17 }
 0x6d5   : > { %2474 = vmatpush3.bf16.msra.mxu1 %v2562_v63 }
 0x6d6   : > { %2475 = vmatprep.subr.bf16.mxu1 %v2655_v17 }
 0x6d9   : > { %2476 = vmatpush3.bf16.msra.mxu1 %v2563_v0 }
 0x6da   : > { %2477 = vmatprep.subr.bf16.mxu1 %v2655_v17 }
 0x6dd   : > { %2478 = vmatpush3.bf16.msra.mxu1 %v2564_v1 }
 0x6de   : > { %2479 = vmatprep.subr.bf16.mxu1 %v2655_v17 }
 0x6e1   : > { %2480 = vmatpush3.bf16.msra.mxu1 %v2565_v4 }
 0x6e2   : > { %2481 = vmatprep.subr.bf16.mxu1 %v2655_v17 }
 0x6e5   : > { %2482 = vmatpush3.bf16.msra.mxu1 %v2566_v5 }
 0x79b   : > { %v1747_v19 = vpop.f32.mrb[28].mxu1 }
 0x79c   : > { %v1748_v20 = vadd.f32 %v2263_v18, %v1747_v19  ;;  %v2457_v21 = vpop.f32.mrb[29].mxu1 }
 0x79d   : > { %v1750_v22 = vpop.f32.mrb[30].mxu1 }
 0x79e   : > { %v3050_v23 = vadd.f32 %v1748_v20, %v2819_v2  ;;  %v1751_v56 = vadd.f32 %v2263_v18, %v1750_v22  ;;  %v2458_v24 = vpop.f32.mrb[31].mxu1 }
 0x7a0   : > { %v3053_v25 = vadd.f32 %v1751_v56, %v2821_v3  ;;  %v1758_v26 = vsel %vm640_vm1, %v3050_v23, 0.0 }
 0x7a1   : > { %1759 = vadd.xlane.f32.xlu0 %v1758_v26 }
 0x7a2   : > { %v1761_v27 = vsel %vm640_vm1, %v3053_v25, 0.0 }
 0x7a3   : > { %1762 = vadd.xlane.f32.xlu1 %v1761_v27 }
 0x82e   : > { %v1760_v28 = vpop.xlane.xlu0 %1759 }
 0x82f   : > { %v1764_v29 = vmul.f32 0.03125, %v1760_v28 }
 0x830   : > { %v1763_v30 = vpop.xlane.xlu1 %1762 }
 0x831   : > { %v1766_v2 = vsub.f32 %v3050_v23, %v1764_v29  ;;  %v1765_v31 = vmul.f32 0.03125, %v1763_v30  ;;  %v2273_v29 = vld [vmem:[%s625_s23] ss:$0 sm:$0xff]  ;;  %s3173_s23 = sld [smem:[#allocation10_spill]] (!%p2282_p5) }
 0x833   : > { %v1767_v32 = vsub.f32 %v3053_v25, %v1765_v31  ;;  %v1768_v3 = vmul.f32 %v1766_v2, %v1766_v2 }
 0x835   : > { %v1770_v33 = vsel %vm640_vm1, %v1768_v3, 0.0  ;;  %v1769_v34 = vmul.f32 %v1767_v32, %v1767_v32 }
 0x836   : > { %1771 = vadd.xlane.f32.xlu0 %v1770_v33 }
 0x837   : > { %v1773_v35 = vsel %vm640_vm1, %v1769_v34, 0.0  ;;  %v2611_v36 = vld [vmem:[%s3173_s23] sm:$0xff] (!%p2282_p5)  }
 0x83a   : > { %1774 = vadd.xlane.f32.xlu0 %v1773_v35 }
 0x8c3   : > { %v1772_v38 = vpop.xlane.xlu0 %1771 }
 0x8c4   : > { %v1776_v40 = vmul.f32 0.03125, %v1772_v38 }
 0x8c6   : > { %v1778_v41 = vadd.f32 1e-05, %v1776_v40 }
 0x8c7   : > { %v1775_v42 = vpop.xlane.xlu0 %1774 }
 0x8c8   : > { %2603 = vrsqrt.f32 %v1778_v41  ;;  %v1777_v43 = vmul.f32 0.03125, %v1775_v42 }
 0x8ca   : > { %v1779_v55 = vadd.f32 1e-05, %v1777_v43 }
 0x8cc   : > { %2605 = vrsqrt.f32 %v1779_v55 }
 0x8d2   : > { %v2604_v45 = vpop.eup %2603 }
 0x8d3   : > { %v1782_v62 = vmul.f32 %v2604_v45, %v1766_v2 }
 0x8d5   : > { %v1790_v47 = vmul.f32 %v2267_v39, %v1782_v62 }
 0x8d6   : > { %v2606_v46 = vpop.eup %2605 }
 0x8d7   : > { %v1783_v48 = vmul.f32 %v2606_v46, %v1767_v32  ;;  %v1798_v51 = vadd.f32 %v2268_v49, %v1790_v47 }
 0x8d9   : > { %v1791_v50 = vmul.f32 %v2267_v39, %v1783_v48 }
 0x8db   : > { %v1799_v54 = vadd.f32 %v2268_v49, %v1791_v50 }
 0x8dd   : > { %v1800_v57 = vpack.c.bf16 %v1799_v54, %v1798_v51 }
 0x8df   : > { %2464 = vmatmul.mubr.msk.bf16.vlgmr.msra.gmra.mrb[40].mxu0 %vm640_vm1, %v1800_v57 }
 0x8e0   : > { %2488 = vmatpush3.bf16.msra.mxu0 (!%p2282_p5), %v2611_v36  ;;  %2491 = vmatprep.mubr.msk.bf16.mxu0 (!%p2282_p5), %vm2666_vm7, %v2665_v37 }
 0x8e1   : > { %2489 = vmatprep.subr.bf16.mxu0 (!%p2282_p5), %v2665_v37 }
 0x9b2   : > { %v1861_v7 = vpop.f32.mrb[40].mxu0 }
 0x9b3   : > { %v1862_v61 = vadd.f32 %v2269_v6, %v1861_v7  ;;  %v2465_v8 = vpop.f32.mrb[41].mxu0 }
 0x9b4   : > { %v1864_v9 = vpop.f32.mrb[42].mxu0 }
 0x9b5   : > { %v1868_v10 = vmul.f32 %v1862_v61, %v1862_v61  ;;  %v1865_v11 = vadd.f32 %v2269_v6, %v1864_v9  ;;  %v2466_v52 = vpop.f32.mrb[43].mxu0 }
 0x9b7   : > { %v1870_v44 = vmul.f32 %v1868_v10, %v1862_v61  ;;  %v1869_v53 = vmul.f32 %v1865_v11, %v1865_v11 }
 0x9b9   : > { %v1872_v12 = vmul.f32 0.044715, %v1870_v44  ;;  %v1871_v13 = vmul.f32 %v1869_v53, %v1865_v11 }
 0x9bb   : > { %v1874_v14 = vadd.f32 %v1872_v12, %v1862_v61  ;;  %v1873_v17 = vmul.f32 0.044715, %v1871_v13 }
 0x9bd   : > { %v1876_v15 = vmul.f32 0.7978846, %v1874_v14  ;;  %v1875_v16 = vadd.f32 %v1873_v17, %v1865_v11 }
 0x9bf   : > { %2607 = vtanh.f32 %v1876_v15  ;;  %v1877_v18 = vmul.f32 0.7978846, %v1875_v16 }
 0x9c1   : > { %2609 = vtanh.f32 %v1877_v18 }
 0x9c9   : > { %v2608_v19 = vpop.eup %2607 }
 0x9ca   : > { %v1880_v20 = vadd.f32 1.0, %v2608_v19 }
 0x9cb   : > { %v2610_v21 = vpop.eup %2609 }
 0x9cc   : > { %v1882_v22 = vmul.f32 0.5, %v1880_v20  ;;  %v1881_v56 = vadd.f32 1.0, %v2610_v21 }
 0x9ce   : > { %v1883_v24 = vmul.f32 0.5, %v1881_v56  ;;  %v1884_v26 = vmul.f32 %v1882_v22, %v1862_v61 }
 0x9d0   : > { %v1885_v27 = vmul.f32 %v1883_v24, %v1865_v11 }
 0x9d2   : > { %v1886_v28 = vpack.c.bf16 %v1885_v27, %v1884_v26 }
 0x9d4   : > { %2484 = vmatmul.mubr.bf16.vlgmr.msra.gmra.mrb[32].mxu1 %v1886_v28 }
 0xaa7   : > { %v1992_v30 = vpop.f32.mrb[32].mxu1 }
 0xaa8   : > { %v1993_v2 = vadd.f32 %v2273_v29, %v1992_v30  ;;  %v2485_v31 = vpop.f32.mrb[33].mxu1  ;;  %2006 = sbr.rel (%p2282_p5) target bundleno = 2962 (0xb92), region = 84 }
 0xaa9   : > { %v1995_v32 = vpop.f32.mrb[34].mxu1 }
 0xaaa   : > { %v1999_v3 = vadd.f32 %v1993_v2, %v3050_v23  ;;  %v1996_v33 = vadd.f32 %v2273_v29, %v1995_v32  ;;  %v2486_v34 = vpop.f32.mrb[35].mxu1  ;;  %v2612_v23 = vld [vmem:[%s3173_s23 + $0x8] sm:$0xff] (!%p2282_p5)  }
 0xaab   : > { %2490 = vmatpush3.bf16.msra.mxu0 (!%p2282_p5), %v2612_v23 }
 0xaac   : > { %2001 = vst.msk [vmem:[#allocation2] sm:$0xff] %vm640_vm1, %v1999_v3  ;;  %v2000_v35 = vadd.f32 %v1996_v33, %v3053_v25 }
 0xaae   : > { %2002 = vst.msk [vmem:[#allocation2 + $0x8] sm:$0xff] %vm640_vm1, %v2000_v35  ;;  %v2007_v25 = vpack.c.bf16 (!%p2282_p5), %v2000_v35, %v1999_v3 }
 0xab0   : > { %2492 = vmatmul.mubr.msk.bf16.vlgmr.msra.gmra.mrb[0].mxu0 %vm640_vm1, %v2007_v25 }
 0xb83   : > { %v2061_v38 = vpop.f32.mrb[0].mxu0 }
 0xb84   : > { %2613 = vtanh.f32 %v2061_v38  ;;  %v2493_v40 = vpop.f32.mrb[1].mxu0 }
 0xb85   : > { %v2064_v41 = vpop.f32.mrb[2].mxu0 }
 0xb86   : > { %2615 = vtanh.f32 %v2064_v41  ;;  %v2494_v42 = vpop.f32.mrb[3].mxu0 }
 0xb8e   : > { %v2614_v43 = vpop.eup %2613 }
 0xb8f   : > { %2070 = vst [vmem:[#allocation3] sm:$0xff] %v2614_v43 }
 0xb90   : > { %v2616_v55 = vpop.eup %2615 }
 0xb91   : > { %2071 = vst [vmem:[#allocation3 + $0x8] sm:$0xff] %v2616_v55 }
 0xb92 PF: > { %p2499_p6 = scmp.eq.s32.totalorder %s2750_s30, 1  ;;  %s2667_s14 = smov [#allocation3]  }
 0xb93   : > { %s2078_s18 = sshll.u32 %s2667_s14, 4  ;;  %s2079_s18 = int_to_ptr.vmem [resolvable:$true] %s2078_s18 }
 0xb94   : > { %s2617_s21 = scalar_lea.vmem %s2079_s18, 256  ;;  %p2624_p10 = scmp.lt.s32.totalorder %s2079_s18, %s2079_s18 }
 0xb95   : > { %p2618_p7 = scmp.ne.s32.totalorder %s2079_s18, %s2617_s21  ;;  %p2625_p11 = scmp.lt.s32.totalorder %s2617_s21, %s2617_s21 }
 0xb97   : > { %p2619_p8 = pnand %p2618_p7, %p2499_p6  ;;  %p2626_p12 = por %p2625_p11, %p2624_p10 }
 0xb99   : > { %p2620_p9 = pneg %p2619_p8 }
 0xb9b   : > { %p2627_p13 = pnand %p2626_p12, %p2620_p9 }
 0xb9d   : > { %2630 = shalt.err (!%p2627_p13)
}
 0xb9e   : > { %s3174_s22 = sld [smem:[#allocation11_spill]] }
 0xba4   : > { %s2631_s26 = scalar_lea.hbm %s3174_s22, 256 }
 0xba5   : > { %p2632_p0 = scmp.ne.s32.totalorder %s3174_s22, %s2631_s26  ;;  %p2637_p3 = scmp.lt.u32.totalorder %s2631_s26, %s3174_s22 }
 0xba7   : > { %p2633_p1 = pnand %p2632_p0, %p2499_p6 }
 0xba9   : > { %p2634_p2 = pneg %p2633_p1 }
 0xbab   : > { %p2639_p4 = pnand %p2637_p3, %p2634_p2 }
 0xbad   : > { %2642 = shalt.err (!%p2639_p4)
}
 0xbae   : > { %s2668_s5 = smov 128  }
 0xbaf   : > { %2496 = dma.vmem_to_hbm [thread:$0]  (%p2499_p6), %s2079_s18, 256, %s3174_s22, [#allocation4], %s2668_s5, %s2668_s5, %s2662_s17  }
 0xbb0   : > { %2648 = dma.done.wait (%p2499_p6), [#allocation4], 256  }
 0xbb1   : > { %2650 = vsyncadd (%p2499_p6), [#allocation4], 4294967040 }
 0xbb2 PF: > { %s3175_s15 = sld [smem:[#allocation6_spill]] }
 0xbb8   : > { %s25_s29 = sadd.s32 1, %s3175_s15  }
 0xbb9   : > { %p22_p5 = scmp.ge.s32.totalorder %s25_s29, 4  }
 0xbbb   :  { %24 = sbr.rel (!%p22_p5) target bundleno = 6 (0x6), region = 144 }
 0xbc2   :  { %2094 = vsyncpa [#allocation4], 1 }
 0xbc3   :  { %2096 = vsyncpa [#allocation4 + $0x1], 1 }

</bundles_post_ra>
